<compile_context>
chip_gen: v5e
topology: v5e:2x2
jax: 0.10.0
libtpu: 0.0.40
codegen_flags: <defaults>
</compile_context>

<pallas_src>
import functools

import jax
import jax.numpy as jnp
from jax.experimental import pallas as pl
from jax.experimental.pallas import tpu as pltpu


# ---------------------------------------------------------------------------
# Kernels
# ---------------------------------------------------------------------------
def _decoder_tail(x, pos_base, w_attn_ref, wo_ref, posw_ref, wgu_ref, wd_ref,
                  hs_out_ref, res_out_ref):
    """Shared body after the residual merge. `x` = hs(+res), f32."""
    tile_s = x.shape[0]
    m = wd_ref.shape[0]                 # mlp_size
    cdt = w_attn_ref.dtype              # bf16 compute dtype for MXU operands

    # ---- attention: silly.attention(q,k,v) == q + k + v -----------------
    x1 = x + 1.0
    attn_lin = jnp.dot(x1.astype(cdt), w_attn_ref[...],
                       preferred_element_type=jnp.float32)
    attn_out = jnp.dot(attn_lin.astype(cdt), wo_ref[...],
                       preferred_element_type=jnp.float32)
    # rank-1 position bias, kept in f32: 2*pos[:,None] * rowsum(Wo)[None,:]
    rows = jax.lax.broadcasted_iota(jnp.int32, (tile_s, 1), 0).astype(jnp.float32)
    pos_col = pos_base + rows                        # (tile_s, 1)
    attn_out = attn_out + pos_col * posw_ref[...]    # posw = 2 * rowsum(Wo)

    # ---- second residual -------------------------------------------------
    x2 = attn_out + x
    res_out_ref[...] = x2.astype(res_out_ref.dtype)

    # ---- MLP: gate_up -> gate * relu(up) -> down -------------------------
    x3 = x2 + 1.0
    gu = jnp.dot(x3.astype(cdt), wgu_ref[...], preferred_element_type=jnp.float32)
    gated = gu[:, :m] * jnp.maximum(gu[:, m:], 0.0)   # M multiple of 128 -> aligned slices
    out = jnp.dot(gated.astype(cdt), wd_ref[...], preferred_element_type=jnp.float32)
    hs_out_ref[...] = out.astype(hs_out_ref.dtype)


def _decoder_kernel_res(pos_smem, hs_ref, res_ref,
                        w_attn_ref, wo_ref, posw_ref, wgu_ref, wd_ref,
                        hs_out_ref, res_out_ref):
    tile_s = hs_ref.shape[0]
    base = pos_smem[pl.program_id(0) * tile_s].astype(jnp.float32)
    x = hs_ref[...] + res_ref[...]
    _decoder_tail(x, base, w_attn_ref, wo_ref, posw_ref, wgu_ref, wd_ref,
                  hs_out_ref, res_out_ref)


def _decoder_kernel_nores(pos_smem, hs_ref,
                          w_attn_ref, wo_ref, posw_ref, wgu_ref, wd_ref,
                          hs_out_ref, res_out_ref):
    tile_s = hs_ref.shape[0]
    base = pos_smem[pl.program_id(0) * tile_s].astype(jnp.float32)
    _decoder_tail(hs_ref[...], base, w_attn_ref, wo_ref, posw_ref, wgu_ref,
                  wd_ref, hs_out_ref, res_out_ref)


# ---------------------------------------------------------------------------
# Wrapper / builders
# ---------------------------------------------------------------------------
def _pick_tile_s(s):
    for t in (256, 128):          # 128-512 rows keeps the MXU M-dim full
        if s % t == 0:
            return t
    return s                      # small / ragged S: single tile


def _vmem_limit_bytes(tile_s, h, m):
    # resident bf16 weights + f32 pos bias
    weights = (h * h + h * h + h * 2 * m + m * h) * 2 + h * 4
    # double-buffered f32 activation tiles: 2 inputs + 2 outputs
    io = 4 * 2 * tile_s * h * 4
    # in-kernel f32 intermediates (attn_lin, attn_out, gu, gated)
    scratch = tile_s * (2 * h + 2 * m + m) * 4
    budget = weights + io + scratch
    # explicit, generation-safe limit (<= 64 MiB so it also fits v7x VMEM)
    return int(min(max(2 * budget, 4 * 1024 * 1024), 64 * 1024 * 1024))


@functools.lru_cache(maxsize=None)
def _build_decoder_call(s, h, m, tile_s, has_residual):
    act_block = (tile_s, h)

    def act_map(i, pos):
        return (i, 0)

    def resident(i, pos):           # weights: same block every step -> no re-DMA
        return (0, 0)

    w_specs = [
        pl.BlockSpec((h, h), resident),          # w_attn_t  (bf16)
        pl.BlockSpec((h, h), resident),          # wo_t      (bf16)
        pl.BlockSpec((1, h), resident),          # pos_w     (f32)
        pl.BlockSpec((h, 2 * m), resident),      # wgu_t     (bf16)
        pl.BlockSpec((m, h), resident),          # wd_t      (bf16)
    ]
    in_specs = [pl.BlockSpec(act_block, act_map)]
    if has_residual:
        in_specs.append(pl.BlockSpec(act_block, act_map))
    in_specs += w_specs

    grid_spec = pltpu.PrefetchScalarGridSpec(
        num_scalar_prefetch=1,                   # positions -> SMEM
        grid=(s // tile_s,),
        in_specs=in_specs,
        out_specs=(pl.BlockSpec(act_block, act_map),
                   pl.BlockSpec(act_block, act_map)),
    )

    kernel = _decoder_kernel_res if has_residual else _decoder_kernel_nores
    return pl.pallas_call(
        kernel,
        out_shape=(jax.ShapeDtypeStruct((s, h), jnp.float32),
                   jax.ShapeDtypeStruct((s, h), jnp.float32)),
        grid_spec=grid_spec,
        compiler_params=pltpu.CompilerParams(
            dimension_semantics=("parallel",),   # megacore on v7x, pipelined elsewhere
            vmem_limit_bytes=_vmem_limit_bytes(tile_s, h, m),
        ),
    )


def prepare_decoder_params(params, compute_dtype=jnp.bfloat16):
    """One-time weight prep (hoisted out of the per-call path).

    Folds Wq+Wk+Wv, pre-transposes to [in,out], casts matmul weights to bf16,
    and precomputes the f32 rank-1 position bias 2*rowsum(Wo).
    """
    wqkv = params["wqkv"].astype(jnp.float32)     # [3H, H] torch layout
    wo = params["wo"].astype(jnp.float32)         # [H, H]
    wgu = params["wgu"].astype(jnp.float32)       # [2M, H]
    wd = params["wd"].astype(jnp.float32)         # [H, M]
    h = wqkv.shape[1]
    w_attn = wqkv[:h] + wqkv[h:2 * h] + wqkv[2 * h:]
    return {
        "w_attn_t": w_attn.T.astype(compute_dtype),           # [H, H]
        "wo_t": wo.T.astype(compute_dtype),                    # [H, H]
        "pos_w": (2.0 * jnp.sum(wo, axis=1)).reshape(1, h),    # [1, H] f32
        "wgu_t": wgu.T.astype(compute_dtype),                  # [H, 2M]
        "wd_t": wd.T.astype(compute_dtype),                    # [M, H]
    }


def llama_decoder_layer(positions, hidden_states, residual, prep, *, tile_s=None):
    """positions: [S] int, hidden_states: [S,H] f32, residual: [S,H] f32 or None."""
    s, h = hidden_states.shape
    m = prep["wd_t"].shape[0]
    if tile_s is None:
        tile_s = _pick_tile_s(s)
    has_res = residual is not None
    call = _build_decoder_call(s, h, m, tile_s, has_res)
    pos_i32 = positions.astype(jnp.int32)
    weights = (prep["w_attn_t"], prep["wo_t"], prep["pos_w"],
               prep["wgu_t"], prep["wd_t"])
    if has_res:
        return call(pos_i32, hidden_states, residual, *weights)
    return call(pos_i32, hidden_states, *weights)


# ---------------------------------------------------------------------------
# Plain-JAX reference mirroring the PyTorch forward exactly (f32, unfused)
# ---------------------------------------------------------------------------
def reference_decoder_layer(pos, hs, res, p):
    if res is None:
        residual = hs
        x = hs + 1.0
    else:
        x = hs + res
        residual = x
        x = x + 1.0
    qkv = x @ p["wqkv"].T
    q, k, v = jnp.split(qkv, 3, axis=-1)
    q = q + pos[:, None]
    k = k + pos[:, None]
    attn = q + k + v
    o = attn @ p["wo"].T
    x = o + residual
    residual2 = x
    x = x + 1.0
    gu = x @ p["wgu"].T
    half = gu.shape[1] // 2
    g = gu[:, :half] * jax.nn.relu(gu[:, half:])
    out = g @ p["wd"].T
    return out, residual2


# ---------------------------------------------------------------------------
if __name__ == "__main__":
    # shapes consistent with the module (hidden=128, mlp=256); S=512 exercises
    # a 2-step grid with TILE_S=256.
    S, H, M = 512, 128, 256

    key = jax.random.PRNGKey(0)
    k1, k2, k3, k4, k5, k6 = jax.random.split(key, 6)

    def xavier_normal(k, out_f, in_f, gain=0.001):
        # deterministic stand-in for nn.init.xavier_normal_ (not bit-exact torch RNG)
        std = gain * (2.0 / (in_f + out_f)) ** 0.5
        return std * jax.random.normal(k, (out_f, in_f), dtype=jnp.float32)

    params = {
        "wqkv": xavier_normal(k1, 3 * H, H),   # qkv_projection.weight     [3H, H]
        "wo":   xavier_normal(k2, H, H),       # output_projection.weight  [H, H]
        "wgu":  xavier_normal(k3, 2 * M, H),   # gate_up_projection.weight [2M, H]
        "wd":   xavier_normal(k4, H, M),       # down_projection.weight    [H, M]
    }
    prep = prepare_decoder_params(params)      # one-time: fold/transpose/bf16

    positions = jnp.arange(S, dtype=jnp.int32)
    pos_f32 = positions.astype(jnp.float32)
    hidden_states = jax.random.normal(k5, (S, H), dtype=jnp.float32)
    residual = jax.random.normal(k6, (S, H), dtype=jnp.float32)

    # --- residual provided -------------------------------------------------
    hs_out, res_out = llama_decoder_layer(positions, hidden_states, residual, prep)
    jax.block_until_ready((hs_out, res_out))
    ref_hs, ref_res = reference_decoder_layer(pos_f32, hidden_states, residual, params)
    assert jnp.allclose(res_out, ref_res, atol=1e-4, rtol=1e-3), "res_out mismatch"
    assert jnp.allclose(hs_out, ref_hs, atol=1e-4, rtol=1e-3), "hs_out mismatch"

    # --- residual is None path ----------------------------------------------
    hs2, res2 = llama_decoder_layer(positions, hidden_states, None, prep)
    jax.block_until_ready((hs2, res2))
    ref_hs2, ref_res2 = reference_decoder_layer(pos_f32, hidden_states, None, params)
    assert jnp.allclose(res2, ref_res2, atol=1e-4, rtol=1e-3), "res_out (None) mismatch"
    assert jnp.allclose(hs2, ref_hs2, atol=1e-4, rtol=1e-3), "hs_out (None) mismatch"

    print("KERNEL_OK")
</pallas_src>

<mosaic_0001>
module attributes {stable_mosaic.version = 11 : i64} {
  func.func @_decoder_kernel_res(%arg0: i32, %arg1: memref<512xi32, #tpu.memory_space<smem>>, %arg2: memref<256x128xf32, #tpu.memory_space<vmem>>, %arg3: memref<256x128xf32, #tpu.memory_space<vmem>>, %arg4: memref<128x128xbf16, #tpu.memory_space<vmem>>, %arg5: memref<128x128xbf16, #tpu.memory_space<vmem>>, %arg6: memref<1x128xf32, #tpu.memory_space<vmem>>, %arg7: memref<128x512xbf16, #tpu.memory_space<vmem>>, %arg8: memref<256x128xbf16, #tpu.memory_space<vmem>>, %arg9: memref<256x128xf32, #tpu.memory_space<vmem>>, %arg10: memref<256x128xf32, #tpu.memory_space<vmem>>) attributes {dimension_semantics = [#tpu.dimension_semantics<parallel>], iteration_bounds = array<i64: 2>, scalar_prefetch = 1 : i64, scratch_operands = 0 : i64, tpu.core_type = #tpu.core_type<tc>, window_params = [{transform_indices = @transform_0, window_bounds = array<i64: 256, 128>}, {transform_indices = @transform_1, window_bounds = array<i64: 256, 128>}, {pipeline_mode = #tpu.pipeline_mode<synchronous>, transform_indices = @transform_2, window_bounds = array<i64: 128, 128>}, {pipeline_mode = #tpu.pipeline_mode<synchronous>, transform_indices = @transform_3, window_bounds = array<i64: 128, 128>}, {pipeline_mode = #tpu.pipeline_mode<synchronous>, transform_indices = @transform_4, window_bounds = array<i64: 1, 128>}, {pipeline_mode = #tpu.pipeline_mode<synchronous>, transform_indices = @transform_5, window_bounds = array<i64: 128, 512>}, {pipeline_mode = #tpu.pipeline_mode<synchronous>, transform_indices = @transform_6, window_bounds = array<i64: 256, 128>}, {transform_indices = @transform_7, window_bounds = array<i64: 256, 128>}, {transform_indices = @transform_8, window_bounds = array<i64: 256, 128>}]} {
    %c256_i32 = arith.constant 256 : i32
    %0 = arith.muli %arg0, %c256_i32 : i32
    %1 = arith.index_cast %0 : i32 to index
    %2 = memref.load %arg1[%1] : memref<512xi32, #tpu.memory_space<smem>>
    %3 = arith.sitofp %2 : i32 to f32
    %c0 = arith.constant 0 : index
    %c0_0 = arith.constant 0 : index
    %4 = vector.load %arg2[%c0, %c0_0] : memref<256x128xf32, #tpu.memory_space<vmem>>, vector<256x128xf32>
    %c0_1 = arith.constant 0 : index
    %c0_2 = arith.constant 0 : index
    %5 = vector.load %arg3[%c0_1, %c0_2] : memref<256x128xf32, #tpu.memory_space<vmem>>, vector<256x128xf32>
    %6 = arith.addf %4, %5 : vector<256x128xf32>
    %cst = arith.constant 1.000000e+00 : f32
    %7 = vector.broadcast %cst : f32 to vector<256x128xf32>
    %8 = arith.addf %6, %7 : vector<256x128xf32>
    %9 = arith.truncf %8 : vector<256x128xf32> to vector<256x128xbf16>
    %c0_3 = arith.constant 0 : index
    %c0_4 = arith.constant 0 : index
    %10 = vector.load %arg4[%c0_3, %c0_4] : memref<128x128xbf16, #tpu.memory_space<vmem>>, vector<128x128xbf16>
    %cst_5 = arith.constant dense<0.000000e+00> : vector<256x128xf32>
    %11 = tpu.matmul %9, %10, %cst_5 {dimension_numbers = #tpu.dot_dimension_numbers<[1], [0], [0], [1], [0, 0, 1, 1], [], []>} : vector<256x128xbf16>, vector<128x128xbf16>, vector<256x128xf32> -> vector<256x128xf32>
    %12 = arith.truncf %11 : vector<256x128xf32> to vector<256x128xbf16>
    %c0_6 = arith.constant 0 : index
    %c0_7 = arith.constant 0 : index
    %13 = vector.load %arg5[%c0_6, %c0_7] : memref<128x128xbf16, #tpu.memory_space<vmem>>, vector<128x128xbf16>
    %cst_8 = arith.constant dense<0.000000e+00> : vector<256x128xf32>
    %14 = tpu.matmul %12, %13, %cst_8 {dimension_numbers = #tpu.dot_dimension_numbers<[1], [0], [0], [1], [0, 0, 1, 1], [], []>} : vector<256x128xbf16>, vector<128x128xbf16>, vector<256x128xf32> -> vector<256x128xf32>
    %15 = tpu.iota {dimensions = array<i32: 0>} : vector<256x1xi32>
    %16 = arith.sitofp %15 : vector<256x1xi32> to vector<256x1xf32>
    %17 = vector.broadcast %3 : f32 to vector<256x1xf32>
    %18 = arith.addf %17, %16 : vector<256x1xf32>
    %c0_9 = arith.constant 0 : index
    %c0_10 = arith.constant 0 : index
    %19 = vector.load %arg6[%c0_9, %c0_10] : memref<1x128xf32, #tpu.memory_space<vmem>>, vector<1x128xf32>
    %20 = vector.broadcast %18 : vector<256x1xf32> to vector<256x128xf32>
    %21 = vector.broadcast %19 : vector<1x128xf32> to vector<256x128xf32>
    %22 = arith.mulf %20, %21 : vector<256x128xf32>
    %23 = arith.addf %14, %22 : vector<256x128xf32>
    %24 = arith.addf %23, %6 : vector<256x128xf32>
    %c0_11 = arith.constant 0 : index
    %c0_12 = arith.constant 0 : index
    %25 = vector.load %arg10[%c0_11, %c0_12] : memref<256x128xf32, #tpu.memory_space<vmem>>, vector<256x128xf32>
    tpu.vector_store %arg10[%c0_11, %c0_12], %24 {strides = array<i32>} : memref<256x128xf32, #tpu.memory_space<vmem>>, vector<256x128xf32>,
    %cst_13 = arith.constant 1.000000e+00 : f32
    %26 = vector.broadcast %cst_13 : f32 to vector<256x128xf32>
    %27 = arith.addf %24, %26 : vector<256x128xf32>
    %28 = arith.truncf %27 : vector<256x128xf32> to vector<256x128xbf16>
    %c0_14 = arith.constant 0 : index
    %c0_15 = arith.constant 0 : index
    %29 = vector.load %arg7[%c0_14, %c0_15] : memref<128x512xbf16, #tpu.memory_space<vmem>>, vector<128x512xbf16>
    %cst_16 = arith.constant dense<0.000000e+00> : vector<256x512xf32>
    %30 = tpu.matmul %28, %29, %cst_16 {dimension_numbers = #tpu.dot_dimension_numbers<[1], [0], [0], [1], [0, 0, 1, 1], [], []>} : vector<256x128xbf16>, vector<128x512xbf16>, vector<256x512xf32> -> vector<256x512xf32>
    %31 = vector.extract_strided_slice %30 {offsets = [0, 0], sizes = [256, 256], strides = [1, 1]} : vector<256x512xf32> to vector<256x256xf32>
    %32 = vector.extract_strided_slice %30 {offsets = [0, 256], sizes = [256, 256], strides = [1, 1]} : vector<256x512xf32> to vector<256x256xf32>
    %cst_17 = arith.constant 0.000000e+00 : f32
    %33 = vector.broadcast %cst_17 : f32 to vector<256x256xf32>
    %34 = arith.maximumf %32, %33 : vector<256x256xf32>
    %35 = arith.mulf %31, %34 : vector<256x256xf32>
    %36 = arith.truncf %35 : vector<256x256xf32> to vector<256x256xbf16>
    %c0_18 = arith.constant 0 : index
    %c0_19 = arith.constant 0 : index
    %37 = vector.load %arg8[%c0_18, %c0_19] : memref<256x128xbf16, #tpu.memory_space<vmem>>, vector<256x128xbf16>
    %cst_20 = arith.constant dense<0.000000e+00> : vector<256x128xf32>
    %38 = tpu.matmul %36, %37, %cst_20 {dimension_numbers = #tpu.dot_dimension_numbers<[1], [0], [0], [1], [0, 0, 1, 1], [], []>} : vector<256x256xbf16>, vector<256x128xbf16>, vector<256x128xf32> -> vector<256x128xf32>
    %c0_21 = arith.constant 0 : index
    %c0_22 = arith.constant 0 : index
    %39 = vector.load %arg9[%c0_21, %c0_22] : memref<256x128xf32, #tpu.memory_space<vmem>>, vector<256x128xf32>
    tpu.vector_store %arg9[%c0_21, %c0_22], %38 {strides = array<i32>} : memref<256x128xf32, #tpu.memory_space<vmem>>, vector<256x128xf32>,
    return
  }
  func.func @transform_0(%arg0: i32, %arg1: memref<512xi32, #tpu.memory_space<smem>>) -> (i32, i32) {
    %c0_i32 = arith.constant 0 : i32
    %c0_i32_0 = arith.constant 0 : i32
    return %arg0, %c0_i32 : i32, i32
  }
  func.func @transform_1(%arg0: i32, %arg1: memref<512xi32, #tpu.memory_space<smem>>) -> (i32, i32) {
    %c0_i32 = arith.constant 0 : i32
    %c0_i32_0 = arith.constant 0 : i32
    return %arg0, %c0_i32 : i32, i32
  }
  func.func @transform_2(%arg0: i32, %arg1: memref<512xi32, #tpu.memory_space<smem>>) -> (i32, i32) {
    %c0_i32 = arith.constant 0 : i32
    %c0_i32_0 = arith.constant 0 : i32
    %c0_i32_1 = arith.constant 0 : i32
    return %c0_i32, %c0_i32_0 : i32, i32
  }
  func.func @transform_3(%arg0: i32, %arg1: memref<512xi32, #tpu.memory_space<smem>>) -> (i32, i32) {
    %c0_i32 = arith.constant 0 : i32
    %c0_i32_0 = arith.constant 0 : i32
    %c0_i32_1 = arith.constant 0 : i32
    return %c0_i32, %c0_i32_0 : i32, i32
  }
  func.func @transform_4(%arg0: i32, %arg1: memref<512xi32, #tpu.memory_space<smem>>) -> (i32, i32) {
    %c0_i32 = arith.constant 0 : i32
    %c0_i32_0 = arith.constant 0 : i32
    %c0_i32_1 = arith.constant 0 : i32
    return %c0_i32, %c0_i32_0 : i32, i32
  }
  func.func @transform_5(%arg0: i32, %arg1: memref<512xi32, #tpu.memory_space<smem>>) -> (i32, i32) {
    %c0_i32 = arith.constant 0 : i32
    %c0_i32_0 = arith.constant 0 : i32
    %c0_i32_1 = arith.constant 0 : i32
    return %c0_i32, %c0_i32_0 : i32, i32
  }
  func.func @transform_6(%arg0: i32, %arg1: memref<512xi32, #tpu.memory_space<smem>>) -> (i32, i32) {
    %c0_i32 = arith.constant 0 : i32
    %c0_i32_0 = arith.constant 0 : i32
    %c0_i32_1 = arith.constant 0 : i32
    return %c0_i32, %c0_i32_0 : i32, i32
  }
  func.func @transform_7(%arg0: i32, %arg1: memref<512xi32, #tpu.memory_space<smem>>) -> (i32, i32) {
    %c0_i32 = arith.constant 0 : i32
    %c0_i32_0 = arith.constant 0 : i32
    return %arg0, %c0_i32 : i32, i32
  }
  func.func @transform_8(%arg0: i32, %arg1: memref<512xi32, #tpu.memory_space<smem>>) -> (i32, i32) {
    %c0_i32 = arith.constant 0 : i32
    %c0_i32_0 = arith.constant 0 : i32
    return %arg0, %c0_i32 : i32, i32
  }
}

</mosaic_0001>

<bundles_post_ra>
// kernel: tpu_custom_call.1
= control target key start
LH: loop header
LB: loop body
LE: loop exit
PB: predicated region body
PF: predicated region fallthrough
CT: control target
= control target key end

     0   :  { %s3196_s12 = smov [#allocation3]   ;;  %s4198_s0 = inlined_call_operand.hbm [shape: s32[512], index: 0, kind: input, shape index: {}]   ;;  %s4199_s1 = inlined_call_operand.hbm [shape: f32[512,128], index: 1, kind: input, shape index: {}]   ;;  %s4200_s2 = inlined_call_operand.hbm [shape: f32[512,128], index: 2, kind: input, shape index: {}]   ;;  %s4201_s3 = inlined_call_operand.hbm [shape: bf16[128,128], index: 3, kind: input, shape index: {}]   ;;  %s4202_s4 = inlined_call_operand.hbm [shape: bf16[128,128], index: 4, kind: input, shape index: {}]   ;;  %s4203_s5 = inlined_call_operand.vmem [shape: f32[1,128], index: 5, kind: input, shape index: {}]   ;;  %s4204_s6 = inlined_call_operand.hbm [shape: bf16[128,512], index: 6, kind: input, shape index: {}]   ;;  %s4205_s7 = inlined_call_operand.hbm [shape: bf16[256,128], index: 7, kind: input, shape index: {}]   ;;  %s4206_s8 = inlined_call_operand.hbm [shape: f32[512,128], index: 8, kind: output, shape index: {0}]   ;;  %s4207_s9 = inlined_call_operand.hbm [shape: f32[512,128], index: 9, kind: output, shape index: {1}]  }
   0x1   :  { %4210 = sst [smem:[#allocation28_spill]] %s4199_s1  ;;  %s16_s11 = sshll.u32 %s4198_s0, 4  ;;  %s17_s11 = int_to_ptr.hbm [resolvable:$true] %s16_s11 }
   0x2   :  { %4211 = sst [smem:[#allocation29_spill]] %s4201_s3 }
   0x3   :  { %4212 = sst [smem:[#allocation30_spill]] %s4202_s4 }
   0x4   :  { %4213 = sst [smem:[#allocation31_spill]] %s4204_s6 }
   0x5   :  { %4214 = sst [smem:[#allocation32_spill]] %s4205_s7 }
   0x6   :  { %19 = dma.hbm_to_smem %s17_s11, 64, %s3196_s12, [#allocation2] }
   0x7   :  { %3150 = dma.done.wait [#allocation2], 64 }
   0x8   :  { %3151 = vsyncadd [#allocation2], 4294967232 }
   0x9   :  { %22 = sfence }
   0xa   :  { %23 = vsyncpa [#allocation5], 0 }
   0xb   :  { %25 = vsyncpa [#allocation5 + $0x1], 0 }
   0xc   :  { %26 = vsyncpa [#allocation8], 0 }
   0xd   :  { %28 = vsyncpa [#allocation8 + $0x1], 0 }
   0xe   :  { %29 = vsyncpa [#allocation11], 0 }
   0xf   :  { %30 = vsyncpa [#allocation14], 0 }
  0x10   :  { %31 = vsyncpa [#allocation6], 0 }
  0x11   :  { %33 = vsyncpa [#allocation6 + $0x1], 0 }
  0x12   :  { %34 = vsyncpa [#allocation17], 0 }
  0x13   :  { %36 = vsyncpa [#allocation17 + $0x1], 0  ;;  %s3262_s13 = smov 0   ;;  %s3264_s14 = smov 0  }
  0x14   :  { %s3266_s0 = smov 0   ;;  %s3268_s15 = smov 0  }
  0x15 LB: > { %4215 = sst [smem:[#allocation26_spill]] %s3190_s0  ;;  %s3283_s16 = sadd.s32 4294967295, %s3194_s15   ;;  %s3194_s15 = sphi %s3268_s15, %s4234_s15   ;;  %s3190_s0 = sphi %s3266_s0, %s4231_s0   ;;  %s3186_s14 = sphi %s3264_s14, %s4233_s14   ;;  %s3182_s13 = sphi %s3262_s13, %s4232_s13  }
  0x16   : > { %s2424_s17 = sadd.s32 4294967294, %s3194_s15   ;;  %p62_p0 = scmp.ne.s32.totalorder %s3186_s14, %s3182_s13 }
  0x17   : > { %p63_p1 = scmp.eq.s32.totalorder %s3283_s16, 0  ;;  %p217_p2 = scmp.eq.s32.totalorder %s3283_s16, 1 }
  0x18   : > { %p223_p3 = scmp.eq.s32.totalorder %s2424_s17, 1  ;;  %p2425_p5 = scmp.ge.s32.totalorder %s3194_s15, 1 }
  0x19   : > { %p3292_p4 = por %p63_p1, %p62_p0  ;;  %p256_p7 = scmp.lt.s32.totalorder %s3194_s15, 3 }
  0x1a   : > { %p3297_p6 = por %p223_p3, %p62_p0  ;;  %s4218_s3 = sld [smem:[#allocation29_spill]] }
  0x1b   : > { %p3305_p8 = pnand %p2425_p5, %p256_p7  ;;  %s3197_s24 = smov [#allocation9]  }
  0x1c   : > { %s269_s25 = sshll.u32 %s3197_s24, 4  ;;  %s4221_s4 = sld [smem:[#allocation30_spill]]  ;;  %s270_s25 = int_to_ptr.vmem [resolvable:$true] %s269_s25 }
  0x1d   : > { %p2803_p9 = pneg %p3305_p8  ;;  %s3198_s30 = smov 64  }
  0x1e   : > { %s3199_s10 = smov 4   ;;  %s3200_s11 = smov [#allocation10]  }
  0x1f   : > { %p3313_p10 = pnand %p2803_p9, %p63_p1  ;;  %s283_s12 = sshll.u32 %s3200_s11, 4  ;;  %s284_s12 = int_to_ptr.vmem [resolvable:$true] %s283_s12 }
  0x20   : > { %s267_s22 = sshll.u32 %s4218_s3, 4  ;;  %s4222_s6 = sld [smem:[#allocation31_spill]]  ;;  %s268_s22 = int_to_ptr.hbm [resolvable:$true] %s267_s22 }
  0x21   : > { %2806 = dma.hbm_to_vmem [thread:$0]  (!%p3313_p10), %s268_s22, 1024, %s270_s25, [#allocation8], %s3198_s30, %s3198_s30, %s3199_s10  }
  0x22   : > { %s281_s29 = sshll.u32 %s4221_s4, 4  ;;  %s3201_s24 = smov [#allocation12]   ;;  %s282_s29 = int_to_ptr.hbm [resolvable:$true] %s281_s29 }
  0x23   : > { %2809 = dma.hbm_to_vmem [thread:$0]  (!%p3313_p10), %s282_s29, 1024, %s284_s12, [#allocation11], %s3198_s30, %s3198_s30, %s3199_s10  }
  0x24   : > { %s300_s27 = sshll.u32 %s3201_s24, 4  ;;  %s4223_s7 = sld [smem:[#allocation32_spill]]  ;;  %s301_s27 = int_to_ptr.vmem [resolvable:$true] %s300_s27 }
  0x25   : > { %s3202_s11 = smov 256   ;;  %s3203_s17 = smov 16  }
  0x26   : > { %s298_s21 = sshll.u32 %s4222_s6, 4  ;;  %s3204_s29 = smov [#allocation13]   ;;  %s299_s21 = int_to_ptr.hbm [resolvable:$true] %s298_s21 }
  0x27   : > { %2812 = dma.hbm_to_vmem [thread:$0]  (!%p3313_p10), %s299_s21, 4096, %s301_s27, [#allocation11], %s3202_s11, %s3202_s11, %s3203_s17  }
  0x28   : > { %s314_s12 = sshll.u32 %s3204_s29, 4  ;;  %s3336_s20 = sadd.s32 1, %s3194_s15   ;;  %s315_s12 = int_to_ptr.vmem [resolvable:$true] %s314_s12 }
  0x29   : > { %s49_s24 = sadd.s32 1, %s3190_s0  ;;  %s46_s22 = ssub.s32 %s3194_s15, %s3336_s20 }
  0x2a   : > { %s312_s28 = sshll.u32 %s4223_s7, 4  ;;  %p56_p12 = scmp.ne.s32.totalorder %s3190_s0, %s3186_s14  ;;  %s313_s28 = int_to_ptr.hbm [resolvable:$true] %s312_s28 }
  0x2b   : > { %2815 = dma.hbm_to_vmem [thread:$0]  (!%p3313_p10), %s313_s28, 2048, %s315_s12, [#allocation14], %s3198_s30, %s3198_s30, %s3199_s10  }
  0x2c   : > { %p47_p13 = scmp.eq.s32.totalorder %s46_s22, 0  ;;  %p57_p0 = scmp.eq.s32.totalorder %s3194_s15, 0 }
  0x2d   : > { %p3346_p3 = por %p217_p2, %p56_p12  ;;  %p2834_p5 = scmp.lt.s32.totalorder %s3194_s15, 2 }
  0x2e   : > { %s3352_s27 = scalar_select %p47_p13, %s3190_s0, %s49_s24  }
  0x2f   : > { %p58_p7 = por %p57_p0, %p56_p12  ;;  %s328_s25 = sand.u32 1, %s3190_s0  }
  0x30   : > { %4225 = sst [smem:[#allocation27_spill]] %s3352_s27  ;;  %s3355_s26 = sshll.u32 %s328_s25, 8 }
  0x31   : > { %s4208_s30 = sshll.u32 %s3194_s15, 8  ;;  %s4226_s1 = sld [smem:[#allocation28_spill]] }
  0x32   : > { %s332_s17 = scalar_lea.vmem [#allocation4], %s3355_s26  ;;  %p3364_p2 = pnand %p2834_p5, %p58_p7 }
  0x33   : > { %s340_s29 = sshll.u32 %s332_s17, 4  ;;  %s329_s24 = scalar_lea.sflag [#allocation5], %s328_s25  ;;  %s341_s29 = int_to_ptr.vmem [resolvable:$true] %s340_s29 }
  0x34   : > { %p3022_p10 = pneg %p3364_p2 }
  0x37   : > { %s337_s11 = scalar_lea.hbm %s4226_s1, %s4208_s30 }
  0x38   : > { %s338_s12 = sshll.u32 %s337_s11, 4  ;;  %s3025_s11 = scalar_lea.hbm %s4226_s1, 512  ;;  %s339_s12 = int_to_ptr.hbm [resolvable:$true] %s338_s12 }
  0x39   : > { %s3018_s3 = sshra.s32 %s339_s12, 4  ;;  %s3019_s3 = int_to_ptr.hbm [resolvable:$true] %s3018_s3 }
  0x3a   : > { %s3020_s4 = scalar_lea.hbm %s3019_s3, 256  ;;  %p3026_p0 = scmp.lt.s32.totalorder %s3019_s3, %s4226_s1 }
  0x3b   : > { %p3021_p9 = scmp.ne.s32.totalorder %s3019_s3, %s3020_s4  ;;  %p3027_p5 = scmp.lt.s32.totalorder %s3025_s11, %s3020_s4 }
  0x3d   : > { %p3023_p12 = pnand %p3022_p10, %p3021_p9  ;;  %p3028_p7 = por %p3027_p5, %p3026_p0 }
  0x3f   : > { %p3024_p13 = pneg %p3023_p12 }
  0x41   : > { %p3029_p11 = pnand %p3028_p7, %p3024_p13 }
  0x43   : > { %3032 = shalt.err (!%p3029_p11)
}
  0x44   : > { %s3205_s25 = smov 128   ;;  %s3206_s6 = smov 8  }
  0x45   : > { %2819 = dma.hbm_to_vmem [thread:$0]  (!%p3364_p2), %s339_s12, 4096, %s341_s29, %s329_s24, %s3205_s25, %s3205_s25, %s3206_s6  }
  0x46   : > { %s4228_s7 = sshll.u32 %s3194_s15, 8  ;;  %s354_s30 = scalar_lea.vmem [#allocation7], %s3355_s26 }
  0x47   : > { %s359_s27 = scalar_lea.hbm %s4200_s2, %s4228_s7  ;;  %s362_s3 = sshll.u32 %s354_s30, 4  ;;  %s363_s3 = int_to_ptr.vmem [resolvable:$true] %s362_s3 }
  0x48   : > { %s360_s4 = sshll.u32 %s359_s27, 4  ;;  %s350_s11 = sand.u32 1, %s3194_s15   ;;  %s361_s4 = int_to_ptr.hbm [resolvable:$true] %s360_s4 }
  0x49   : > { %s351_s17 = scalar_lea.sflag [#allocation8], %s350_s11  ;;  %s3048_s1 = sshra.s32 %s361_s4, 4  ;;  %s3049_s1 = int_to_ptr.hbm [resolvable:$true] %s3048_s1 }
  0x4a   : > { %s3050_s0 = scalar_lea.hbm %s3049_s1, 256  ;;  %s3055_s24 = scalar_lea.hbm %s4200_s2, 512 }
  0x4b   : > { %p3051_p11 = scmp.ne.s32.totalorder %s3049_s1, %s3050_s0  ;;  %p3056_p13 = scmp.lt.s32.totalorder %s3049_s1, %s4200_s2 }
  0x4c   : > { %p3057_p0 = scmp.lt.s32.totalorder %s3055_s24, %s3050_s0 }
  0x4d   : > { %p3053_p9 = pnand %p3051_p11, %p3022_p10 }
  0x4e   : > { %p3058_p5 = por %p3057_p0, %p3056_p13 }
  0x4f   : > { %p3054_p12 = pneg %p3053_p9 }
  0x51   : > { %p3059_p7 = pnand %p3058_p5, %p3054_p12 }
  0x53   : > { %3062 = shalt.err (!%p3059_p7)
}
  0x54   : > { %2822 = dma.hbm_to_vmem [thread:$0]  (!%p3364_p2), %s361_s4, 4096, %s363_s3, %s351_s17, %s3205_s25, %s3205_s25, %s3206_s6  }
  0x55   : > { %374 = sbr.rel (%p3305_p8) target bundleno = 1051 (0x41b), region = 48  ;;  %s3402_s27 = sand.u32 (!%p3305_p8), 1, %s3186_s14  }
  0x56   : > { %s3405_s10 = sshll.u32 (!%p3305_p8), %s3402_s27, 8  ;;  %s377_s1 = scalar_lea.sflag (!%p3305_p8), [#allocation5], %s3402_s27 }
  0x57   : > { %s3409_s0 = scalar_lea.vmem (!%p3305_p8), [#allocation4], %s3405_s10 }
  0x5a   : > { %3153 = dma.done.wait (%p3292_p4), %s377_s1, 4096  }
  0x5b   : > { %3155 = vsyncadd (%p3292_p4), %s377_s1, 4294963200  ;;  %s386_s6 = sand.u32 1, %s3283_s16   ;;  %s3417_s22 = scalar_lea.vmem [#allocation7], %s3405_s10 }
  0x5c   : > { %s387_s23 = scalar_lea.sflag [#allocation8], %s386_s6 }
  0x5d   : > { %3157 = dma.done.wait (%p3292_p4), %s387_s23, 4096  }
  0x5e   : > { %3159 = vsyncadd (%p3292_p4), %s387_s23, 4294963200 }
  0x5f   : > { %3161 = dma.done.wait (%p63_p1), [#allocation8], 1024  }
  0x60   : > { %3163 = vsyncadd (%p63_p1), [#allocation8], 4294966272 }
  0x61   : > { %3165 = dma.done.wait (%p63_p1), [#allocation11], 5120  }
  0x62   : > { %3167 = vsyncadd (%p63_p1), [#allocation11], 4294962176 }
  0x63   : > { %3169 = dma.done.wait (%p63_p1), [#allocation14], 2048  }
  0x64   : > { %3171 = vsyncadd (%p63_p1), [#allocation14], 4294965248  ;;  %v2720_v0 = vld [vmem:[#allocation9 + $0x38] sm:$0xff]  ;;  %v2719_v1 = vld [vmem:[#allocation9 + $0x30] sm:$0xff]  ;;  %s3596_s18 = sshll.u32 %s3283_s16, 8  ;;  %s3616_s3 = scalar_lea.vmem [#allocation16], %s3405_s10 }
  0x65   : > { %669 = vmatpush.bf16.msra.mxu0 %v2720_v0  ;;  %v2718_v2 = vld [vmem:[#allocation9 + $0x28] sm:$0xff]  ;;  %v2717_v3 = vld [vmem:[#allocation9 + $0x20] sm:$0xff]  ;;  %v2716_v4 = vld [vmem:[#allocation9 + $0x18] sm:$0xff]  ;;  %s459_s25 = sld [smem:[#allocation3 + %s3596_s18]]  ;;  %s4073_s4 = scalar_lea.vmem [#allocation15], %s3405_s10 }
  0x66   : > { %v2715_v5 = vld [vmem:[#allocation9 + $0x10] sm:$0xff]  ;;  %v461_v6 = vld [vmem:[%s3409_s0] sm:$0xff]  ;;  %v462_v7 = vld [vmem:[%s3409_s0 + $0x8] sm:$0xff]  ;;  %s2253_s29 = scalar_lea.hbm %s4207_s9, %s3596_s18  ;;  %s2254_s24 = sshll.u32 %s3616_s3, 4  ;;  %s2255_s24 = int_to_ptr.vmem [resolvable:$true] %s2254_s24 }
  0x67   : > { %v493_v8 = vld [vmem:[%s3417_s22] sm:$0xff]  ;;  %v494_v9 = vld [vmem:[%s3417_s22 + $0x8] sm:$0xff]  ;;  %v463_v17 = vld [vmem:[%s3409_s0 + $0x10] sm:$0xff]  ;;  %s2256_s12 = sshll.u32 %s2253_s29, 4  ;;  %s2225_s7 = scalar_lea.sflag [#allocation17], %s3402_s27  ;;  %s2257_s12 = int_to_ptr.hbm [resolvable:$true] %s2256_s12 }
  0x68   : > { %v3439_v10 = vadd.f32 %v493_v8, %v461_v6  ;;  %v3441_v11 = vadd.f32 %v494_v9, %v462_v7  ;;  %v2714_v12 = vld [vmem:[#allocation9 + $0x8] sm:$0xff]  ;;  %v2713_v15 = vld [vmem:[#allocation9] sm:$0xff]  ;;  %v464_v18 = vld [vmem:[%s3409_s0 + $0x18] sm:$0xff]  ;;  %s3092_s26 = sshra.s32 %s2257_s12, 4  ;;  %s3098_s6 = scalar_lea.hbm %s4207_s9, 512  ;;  %s3093_s26 = int_to_ptr.hbm [resolvable:$true] %s3092_s26 }
  0x69   : > { %670 = vmatpush.bf16.msra.mxu0 %v2719_v1  ;;  %v495_v19 = vld [vmem:[%s3417_s22 + $0x10] sm:$0xff]  ;;  %v496_v20 = vld [vmem:[%s3417_s22 + $0x18] sm:$0xff]  ;;  %v465_v26 = vld [vmem:[%s3409_s0 + $0x20] sm:$0xff]  ;;  %s3094_s10 = scalar_lea.hbm %s3093_s26, 256  ;;  %p3099_p2 = scmp.lt.s32.totalorder %s3093_s26, %s4207_s9 }
  0x6a   : > { %v557_v13 = vadd.f32 1.0, %v3439_v10  ;;  %v558_v14 = vadd.f32 1.0, %v3441_v11  ;;  %v3449_v21 = vadd.f32 %v495_v19, %v463_v17  ;;  %v3451_v22 = vadd.f32 %v496_v20, %v464_v18  ;;  %v466_v27 = vld [vmem:[%s3409_s0 + $0x28] sm:$0xff]  ;;  %v497_v28 = vld [vmem:[%s3417_s22 + $0x20] sm:$0xff]  ;;  %v467_v35 = vld [vmem:[%s3409_s0 + $0x30] sm:$0xff]  ;;  %p3095_p1 = scmp.ne.s32.totalorder %s3093_s26, %s3094_s10  ;;  %p3100_p10 = scmp.lt.s32.totalorder %s3098_s6, %s3094_s10 }
  0x6b   : > { %v498_v29 = vld [vmem:[%s3417_s22 + $0x28] sm:$0xff]  ;;  %v3459_v30 = vadd.f32 %v497_v28, %v465_v26  ;;  %v468_v36 = vld [vmem:[%s3409_s0 + $0x38] sm:$0xff]  ;;  %v499_v37 = vld [vmem:[%s3417_s22 + $0x30] sm:$0xff]  ;;  %s460_s16 = scvt.s32.f32 %s459_s25 }
  0x6c   : > { %v589_v16 = vpack.c.bf16 %v558_v14, %v557_v13  ;;  %v559_v23 = vadd.f32 1.0, %v3449_v21  ;;  %v560_v24 = vadd.f32 1.0, %v3451_v22  ;;  %v3461_v31 = vadd.f32 %v498_v29, %v466_v27  ;;  %v500_v38 = vld [vmem:[%s3417_s22 + $0x38] sm:$0xff]  ;;  %v469_v44 = vld [vmem:[%s3409_s0 + $0x40] sm:$0xff]  ;;  %v470_v45 = vld [vmem:[%s3409_s0 + $0x48] sm:$0xff]  ;;  %p3096_p4 = pnand %p3095_p1, %p3346_p3  ;;  %p3101_p11 = por %p3100_p10, %p3099_p2 }
  0x6d   : > { %671 = vmatpush.bf16.msra.mxu0 %v2718_v2  ;;  %v561_v32 = vadd.f32 1.0, %v3459_v30  ;;  %v3469_v39 = vadd.f32 %v499_v37, %v467_v35  ;;  %v3471_v40 = vadd.f32 %v500_v38, %v468_v36  ;;  %v501_v46 = vld [vmem:[%s3417_s22 + $0x40] sm:$0xff]  ;;  %v502_v47 = vld [vmem:[%s3417_s22 + $0x48] sm:$0xff]  ;;  %v471_v53 = vld [vmem:[%s3409_s0 + $0x50] sm:$0xff] }
  0x6e   : > { %v590_v25 = vpack.c.bf16 %v560_v24, %v559_v23  ;;  %v562_v33 = vadd.f32 1.0, %v3461_v31  ;;  %v3479_v48 = vadd.f32 %v501_v46, %v469_v44  ;;  %v3481_v49 = vadd.f32 %v502_v47, %v470_v45  ;;  %v2728_v54 = vld [vmem:[#allocation10 + $0x38] sm:$0xff]  ;;  %v503_v56 = vld [vmem:[%s3417_s22 + $0x50] sm:$0xff]  ;;  %v2726_v0 = vld [vmem:[#allocation10 + $0x28] sm:$0xff]  ;;  %p3097_p8 = pneg %p3096_p4 }
  0x6f   : > { %v563_v41 = vadd.f32 1.0, %v3469_v39  ;;  %v564_v42 = vadd.f32 1.0, %v3471_v40  ;;  %v472_v55 = vld [vmem:[%s3409_s0 + $0x58] sm:$0xff]  ;;  %972 = vmatpush.bf16.msra.mxu1 %v2728_v54  ;;  %v2727_v58 = vld [vmem:[#allocation10 + $0x30] sm:$0xff]  ;;  %v3489_v59 = vadd.f32 %v503_v56, %v471_v53  ;;  %v473_v1 = vld [vmem:[%s3409_s0 + $0x60] sm:$0xff] }
  0x70   : > { %v591_v34 = vpack.c.bf16 %v562_v33, %v561_v32  ;;  %v565_v50 = vadd.f32 1.0, %v3479_v48  ;;  %v566_v51 = vadd.f32 1.0, %v3481_v49  ;;  %v504_v57 = vld [vmem:[%s3417_s22 + $0x58] sm:$0xff]  ;;  %v474_v2 = vld [vmem:[%s3409_s0 + $0x68] sm:$0xff]  ;;  %v2723_v13 = vld [vmem:[#allocation10 + $0x10] sm:$0xff]  ;;  %p3102_p9 = pnand %p3101_p11, %p3097_p8 }
  0x71   : > { %672 = vmatpush.bf16.msra.mxu0 %v2717_v3  ;;  %v592_v43 = vpack.c.bf16 %v564_v42, %v563_v41  ;;  %v3491_v60 = vadd.f32 %v504_v57, %v472_v55  ;;  %v567_v61 = vadd.f32 1.0, %v3489_v59  ;;  %v505_v3 = vld [vmem:[%s3417_s22 + $0x60] sm:$0xff]  ;;  %v2724_v8 = vld [vmem:[#allocation10 + $0x18] sm:$0xff]  ;;  %v507_v18 = vld [vmem:[%s3417_s22 + $0x70] sm:$0xff] }
  0x72   : > { %v593_v52 = vpack.c.bf16 %v566_v51, %v565_v50  ;;  %v3499_v6 = vadd.f32 %v505_v3, %v473_v1  ;;  %v476_v17 = vld [vmem:[%s3409_s0 + $0x78] sm:$0xff]  ;;  %v2721_v24 = vld [vmem:[#allocation10] sm:$0xff]  ;;  %v2633_v27 = vld [vmem:[#allocation12 + $0xe8] sm:$0xf] }
  0x73   : > { %973 = vmatpush.bf16.msra.mxu1 %v2727_v58  ;;  %v568_v62 = vadd.f32 1.0, %v3491_v60  ;;  %v508_v19 = vld [vmem:[%s3417_s22 + $0x78] sm:$0xff]  ;;  %v2758_v29 = vld [vmem:[#allocation12 + $0xec] sm:$0xf]  ;;  %v477_v36 = vld [vmem:[%s3409_s0 + $0x80] sm:$0xff] }
  0x74   : > { %v569_v9 = vadd.f32 1.0, %v3499_v6  ;;  %v3511_v23 = vadd.f32 %v508_v19, %v476_v17  ;;  %v2760_v28 = vld [vmem:[#allocation12 + $0xf4] sm:$0xf0]  ;;  %v2635_v33 = vld [vmem:[#allocation12 + $0xf8] sm:$0xf0]  ;;  %v478_v37 = vld [vmem:[%s3409_s0 + $0x88] sm:$0xff] }
  0x75   : > { %673 = vmatpush.bf16.msra.mxu0 %v2716_v4  ;;  %v594_v63 = vpack.c.bf16 %v568_v62, %v567_v61  ;;  %v506_v4 = vld [vmem:[%s3417_s22 + $0x68] sm:$0xff]  ;;  %v2634_v32 = vor.u32 %v2760_v28, %v2633_v27  ;;  %v509_v38 = vld [vmem:[%s3417_s22 + $0x80] sm:$0xff]  ;;  %v479_v50 = vld [vmem:[%s3409_s0 + $0x90] sm:$0xff] }
  0x76   : > { %v3501_v7 = vadd.f32 %v506_v4, %v474_v2  ;;  %v572_v26 = vadd.f32 1.0, %v3511_v23  ;;  %v510_v41 = vld [vmem:[%s3417_s22 + $0x88] sm:$0xff]  ;;  %v3519_v42 = vadd.f32 %v509_v38, %v477_v36  ;;  %v480_v51 = vld [vmem:[%s3409_s0 + $0x98] sm:$0xff]  ;;  %v515_v28 = vld [vmem:[%s3417_s22 + $0xb0] sm:$0xff] }
  0x77   : > { %974 = vmatpush.bf16.msra.mxu1 %v2726_v0  ;;  %v512_v53 = vld [vmem:[%s3417_s22 + $0x98] sm:$0xff]  ;;  %v2617_v62 = vld [vmem:[#allocation12 + $0xc8] sm:$0xf]  ;;  %v2754_v0 = vld [vmem:[#allocation12 + $0xcc] sm:$0xf] }
  0x78   : > { %v573_v44 = vadd.f32 1.0, %v3519_v42  ;;  %v3531_v55 = vadd.f32 %v512_v53, %v480_v51  ;;  %v2619_v2 = vld [vmem:[#allocation12 + $0xd8] sm:$0xf0]  ;;  %v2601_v38 = vld [vmem:[#allocation12 + $0xa8] sm:$0xf] }
  0x79   : > { %674 = vmatpush.bf16.msra.mxu0 %v2715_v5  ;;  %v2725_v5 = vld [vmem:[#allocation10 + $0x20] sm:$0xff]  ;;  %v2622_v3 = vor.u32 %v2754_v0, %v2619_v2  ;;  %v484_v27 = vld [vmem:[%s3409_s0 + $0xb8] sm:$0xff]  ;;  %v486_v53 = vld [vmem:[%s3409_s0 + $0xc8] sm:$0xff] }
  0x7a   : > { %v576_v61 = vadd.f32 1.0, %v3531_v55 }
  0x7b   : > { %975 = vmatpush.bf16.msra.mxu1 %v2725_v5 }
  0x7d   : > { %675 = vmatpush.bf16.msra.mxu0 %v2714_v12  ;;  %v570_v12 = vadd.f32 1.0, %v3501_v7 }
  0x7f   : > { %976 = vmatpush.bf16.msra.mxu1 %v2724_v8  ;;  %v595_v14 = vpack.c.bf16 %v570_v12, %v569_v9  ;;  %v481_v8 = vld [vmem:[%s3409_s0 + $0xa0] sm:$0xff]  ;;  %v482_v9 = vld [vmem:[%s3409_s0 + $0xa8] sm:$0xff] }
  0x80   : > { %v513_v12 = vld [vmem:[%s3417_s22 + $0xa0] sm:$0xff] }
  0x81   : > { %676 = vmatpush.bf16.msra.mxu0 %v2713_v15  ;;  %v475_v15 = vld [vmem:[%s3409_s0 + $0x70] sm:$0xff] }
  0x82   : > { %v3509_v20 = vadd.f32 %v507_v18, %v475_v15 }
  0x83   : > { %977 = vmatpush.bf16.msra.mxu1 %v2723_v13  ;;  %v514_v13 = vld [vmem:[%s3417_s22 + $0xa8] sm:$0xff] }
  0x84   : > { %677 = vmatmul.bf16.vlgmr.msra.gmra.mxu0 %v589_v16  ;;  %v2722_v16 = vld [vmem:[#allocation10 + $0x8] sm:$0xff]  ;;  %v3541_v15 = vadd.f32 %v514_v13, %v482_v9  ;;  %v520_v9 = vld [vmem:[%s3417_s22 + $0xd8] sm:$0xff] }
  0x85   : > { %1543 = vmatpush.bf16.msrb.mxu0 %v2634_v32 }
  0x86   : > { %v578_v19 = vadd.f32 1.0, %v3541_v15 }
  0x87   : > { %978 = vmatpush.bf16.msra.mxu1 %v2722_v16 }
  0x8b   : > { %979 = vmatpush.bf16.msra.mxu1 %v2721_v24 }
  0x94   : > { %682 = vmatmul.bf16.gmra.mxu0 %v590_v25  ;;  %v571_v25 = vadd.f32 1.0, %v3509_v20 }
  0x96   : > { %v596_v35 = vpack.c.bf16 %v572_v26, %v571_v25  ;;  %v483_v26 = vld [vmem:[%s3409_s0 + $0xb0] sm:$0xff] }
  0x97   : > { %v3549_v32 = vadd.f32 %v515_v28, %v483_v26  ;;  %v2746_v26 = vld [vmem:[#allocation12 + $0x8c] sm:$0xf]  ;;  %v2587_v28 = vld [vmem:[#allocation12 + $0x98] sm:$0xf0] }
  0x99   : > { %v579_v36 = vadd.f32 1.0, %v3549_v32 }
  0xa4   : > { %687 = vmatmul.bf16.gmra.mxu0 %v591_v34  ;;  %v2638_v34 = vor.u32 %v2758_v29, %v2635_v33  ;;  %v516_v29 = vld [vmem:[%s3417_s22 + $0xb8] sm:$0xff] }
  0xa5   : > { %v3551_v33 = vadd.f32 %v516_v29, %v484_v27  ;;  %v2590_v29 = vor.u32 %v2746_v26, %v2587_v28  ;;  %v2747_v26 = vld [vmem:[#allocation12 + $0x8c] sm:$0xf0]  ;;  %v2745_v28 = vld [vmem:[#allocation12 + $0x84] sm:$0xf] }
  0xa6   : > { %1632 = vmatpush.bf16.msrb.mxu1 %v2638_v34 }
  0xaa   : > { %1633 = vmatpush.bf16.msrb.mxu1 %v2622_v3 }
  0xb4   : > { %692 = vmatmul.bf16.gmra.mxu0 %v592_v43  ;;  %v3521_v43 = vadd.f32 %v510_v41, %v478_v37  ;;  %v580_v37 = vadd.f32 1.0, %v3551_v33  ;;  %v2752_v41 = vld [vmem:[#allocation12 + $0xb4] sm:$0xf0] }
  0xb6   : > { %v574_v45 = vadd.f32 1.0, %v3521_v43 }
  0xb8   : > { %v597_v46 = vpack.c.bf16 %v574_v45, %v573_v44  ;;  %v2750_v44 = vld [vmem:[#allocation12 + $0xac] sm:$0xf]  ;;  %v2602_v45 = vor.u32 %v2752_v41, %v2601_v38  ;;  %v521_v38 = vld [vmem:[%s3417_s22 + $0xe0] sm:$0xff] }
  0xb9   : > { %v522_v41 = vld [vmem:[%s3417_s22 + $0xe8] sm:$0xff] }
  0xc4   : > { %697 = vmatmul.bf16.gmra.mxu0 %v593_v52  ;;  %v511_v52 = vld [vmem:[%s3417_s22 + $0x90] sm:$0xff] }
  0xc5   : > { %v3529_v54 = vadd.f32 %v511_v52, %v479_v50  ;;  %v600_v50 = vpack.c.bf16 %v580_v37, %v579_v36  ;;  %v485_v52 = vld [vmem:[%s3409_s0 + $0xc0] sm:$0xff]  ;;  %v490_v37 = vld [vmem:[%s3409_s0 + $0xe8] sm:$0xff] }
  0xc6   : > { %v489_v36 = vld [vmem:[%s3409_s0 + $0xe0] sm:$0xff] }
  0xc7   : > { %v575_v58 = vadd.f32 1.0, %v3529_v54 }
  0xc9   : > { %v598_v4 = vpack.c.bf16 %v576_v61, %v575_v58 }
  0xd4   : > { %702 = vmatmul.bf16.gmra.mxu0 %v594_v63  ;;  %v2756_v63 = vld [vmem:[#allocation12 + $0xd4] sm:$0xf0] }
  0xd5   : > { %v2618_v1 = vor.u32 %v2756_v63, %v2617_v62 }
  0xd7   : > { %1544 = vmatpush.bf16.msrb.mxu0 %v2618_v1 }
  0xdb   : > { %1545 = vmatpush.bf16.msrb.mxu0 %v2602_v45  ;;  %v3581_v45 = vadd.f32 %v522_v41, %v490_v37  ;;  %v523_v37 = vld [vmem:[%s3417_s22 + $0xf0] sm:$0xff] }
  0xe4   : > { %707 = vmatmul.bf16.gmra.mxu0 %v595_v14  ;;  %v3539_v14 = vadd.f32 %v513_v12, %v481_v8  ;;  %v519_v8 = vld [vmem:[%s3417_s22 + $0xd0] sm:$0xff] }
  0xe6   : > { %v577_v18 = vadd.f32 1.0, %v3539_v14 }
  0xe8   : > { %v599_v24 = vpack.c.bf16 %v578_v19, %v577_v18 }
  0xf4   : > { %712 = vmatmul.bf16.gmra.mxu0 %v596_v35 }
 0x101   : > { %v678_v47 = vpop.f32.mrf.mxu0 }
 0x104   : > { %717 = vmatmul.bf16.gmra.mxu0 %v597_v46  ;;  %v2603_v46 = vld [vmem:[#allocation12 + $0xb8] sm:$0xf0] }
 0x109   : > { %v680_v56 = vpop.f32.mrf.mxu0 }
 0x10a   : > { %v758_v57 = vpack.c.bf16 %v680_v56, %v678_v47  ;;  %v2606_v47 = vor.u32 %v2750_v44, %v2603_v46  ;;  %v517_v56 = vld [vmem:[%s3417_s22 + $0xc0] sm:$0xff]  ;;  %v3579_v44 = vadd.f32 %v521_v38, %v489_v36  ;;  %v492_v36 = vld [vmem:[%s3409_s0 + $0xf8] sm:$0xff] }
 0x10b   : > { %v3559_v58 = vadd.f32 %v517_v56, %v485_v52  ;;  %v2625_v46 = vld [vmem:[#allocation12 + $0xe0] sm:$0xf]  ;;  %v524_v38 = vld [vmem:[%s3417_s22 + $0xf8] sm:$0xff] }
 0x10c   : > { %980 = vmatmul.bf16.vlgmr.msra.gmra.mxu1 %v758_v57  ;;  %v518_v57 = vld [vmem:[%s3417_s22 + $0xc8] sm:$0xff] }
 0x10d   : > { %1634 = vmatpush.bf16.msrb.mxu1 %v2606_v47  ;;  %v3561_v61 = vadd.f32 %v518_v57, %v486_v53  ;;  %v581_v0 = vadd.f32 1.0, %v3559_v58  ;;  %v2759_v47 = vld [vmem:[#allocation12 + $0xec] sm:$0xf0]  ;;  %v2627_v53 = vld [vmem:[#allocation12 + $0xf0] sm:$0xf0] }
 0x10e   : > { %v2626_v52 = vor.u32 %v2759_v47, %v2625_v46  ;;  %v3591_v47 = vadd.f32 %v524_v38, %v492_v36  ;;  %v2733_v36 = vld [vmem:[#allocation12 + $0x24] sm:$0xf] }
 0x10f   : > { %v582_v1 = vadd.f32 1.0, %v3561_v61 }
 0x110   : > { %1365 = vmatpush.bf16.msra.mxu2 %v2626_v52  ;;  %v2741_v52 = vld [vmem:[#allocation12 + $0x64] sm:$0xf] }
 0x111   : > { %v683_v5 = vpop.f32.mrf.mxu0  ;;  %v601_v2 = vpack.c.bf16 %v582_v1, %v581_v0  ;;  %1635 = vmatpush.bf16.msrb.mxu1 %v2590_v29  ;;  %v2609_v0 = vld [vmem:[#allocation12 + $0xc0] sm:$0xf]  ;;  %v2755_v1 = vld [vmem:[#allocation12 + $0xcc] sm:$0xf0]  ;;  %v2579_v29 = vld [vmem:[#allocation12 + $0x90] sm:$0xf0] }
 0x112   : > { %v2582_v41 = vor.u32 %v2745_v28, %v2579_v29 }
 0x114   : > { %722 = vmatmul.bf16.gmra.mxu0 %v598_v4  ;;  %v487_v4 = vld [vmem:[%s3409_s0 + $0xd0] sm:$0xff] }
 0x115   : > { %v3569_v12 = vadd.f32 %v519_v8, %v487_v4  ;;  %v2611_v4 = vld [vmem:[#allocation12 + $0xd0] sm:$0xf0] }
 0x117   : > { %v583_v18 = vadd.f32 1.0, %v3569_v12 }
 0x119   : > { %v685_v16 = vpop.f32.mrf.mxu0 }
 0x11a   : > { %v759_v17 = vpack.c.bf16 %v685_v16, %v683_v5  ;;  %v488_v5 = vld [vmem:[%s3409_s0 + $0xd8] sm:$0xff] }
 0x11b   : > { %v3571_v13 = vadd.f32 %v520_v9, %v488_v5  ;;  %v2593_v9 = vld [vmem:[#allocation12 + $0xa0] sm:$0xf] }
 0x11c   : > { %985 = vmatmul.bf16.gmra.mxu1 %v759_v17 }
 0x11d   : > { %v584_v19 = vadd.f32 1.0, %v3571_v13 }
 0x121   : > { %v688_v25 = vpop.f32.mrf.mxu0 }
 0x124   : > { %727 = vmatmul.bf16.gmra.mxu0 %v599_v24  ;;  %v2585_v24 = vld [vmem:[#allocation12 + $0x88] sm:$0xf] }
 0x129   : > { %v690_v34 = vpop.f32.mrf.mxu0 }
 0x12a   : > { %v760_v35 = vpack.c.bf16 %v690_v34, %v688_v25  ;;  %v2748_v25 = vld [vmem:[#allocation12 + $0x94] sm:$0xf0]  ;;  %v602_v34 = vpack.c.bf16 %v584_v19, %v583_v18 }
 0x12b   : > { %v2586_v27 = vor.u32 %v2748_v25, %v2585_v24  ;;  %v2595_v24 = vld [vmem:[#allocation12 + $0xb0] sm:$0xf0]  ;;  %v2577_v25 = vld [vmem:[#allocation12 + $0x80] sm:$0xf] }
 0x12c   : > { %990 = vmatmul.bf16.gmra.mxu1 %v760_v35 }
 0x12d   : > { %1546 = vmatpush.bf16.msrb.mxu0 %v2586_v27 }
 0x131   : > { %v693_v51 = vpop.f32.mrf.mxu0 }
 0x134   : > { %732 = vmatmul.bf16.gmra.mxu0 %v600_v50  ;;  %v2757_v50 = vld [vmem:[#allocation12 + $0xe4] sm:$0xf] }
 0x135   : > { %v2630_v57 = vor.u32 %v2757_v50, %v2627_v53  ;;  %v2561_v50 = vld [vmem:[#allocation12 + $0x60] sm:$0xf] }
 0x137   : > { %1454 = vmatpush.bf16.msra.mxu3 %v2630_v57  ;;  %v2563_v57 = vld [vmem:[#allocation12 + $0x70] sm:$0xf0] }
 0x139   : > { %v695_v62 = vpop.f32.mrf.mxu0 }
 0x13a   : > { %v761_v63 = vpack.c.bf16 %v695_v62, %v693_v51  ;;  %v585_v62 = vadd.f32 1.0, %v3579_v44 }
 0x13c   : > { %995 = vmatmul.bf16.gmra.mxu1 %v761_v63  ;;  %v586_v63 = vadd.f32 1.0, %v3581_v45 }
 0x13e   : > { %v603_v8 = vpack.c.bf16 %v586_v63, %v585_v62  ;;  %v2569_v62 = vld [vmem:[#allocation12 + $0x68] sm:$0xf]  ;;  %v2744_v63 = vld [vmem:[#allocation12 + $0x74] sm:$0xf0] }
 0x141   : > { %v698_v3 = vpop.f32.mrf.mxu0 }
 0x144   : > { %737 = vmatmul.bf16.gmra.mxu0 %v601_v2  ;;  %v2753_v2 = vld [vmem:[#allocation12 + $0xc4] sm:$0xf] }
 0x145   : > { %v2614_v5 = vor.u32 %v2753_v2, %v2611_v4  ;;  %v2570_v2 = vor.u32 %v2744_v63, %v2569_v62  ;;  %v588_v4 = vadd.f32 1.0, %v3591_v47  ;;  %v2729_v62 = vld [vmem:[#allocation12 + $0x4] sm:$0xf] }
 0x147   : > { %1455 = vmatpush.bf16.msra.mxu3 %v2614_v5  ;;  %v2545_v5 = vld [vmem:[#allocation12 + $0x40] sm:$0xf]  ;;  %1547 = vmatpush.bf16.msrb.mxu0 %v2570_v2  ;;  %v2732_v2 = vld [vmem:[#allocation12 + $0x14] sm:$0xf0] }
 0x149   : > { %v700_v16 = vpop.f32.mrf.mxu0 }
 0x14a   : > { %v762_v17 = vpack.c.bf16 %v700_v16, %v698_v3  ;;  %v2610_v3 = vor.u32 %v2755_v1, %v2609_v0  ;;  %v2751_v16 = vld [vmem:[#allocation12 + $0xac] sm:$0xf0]  ;;  %v2566_v1 = vor.u32 %v2741_v52, %v2563_v57 }
 0x14b   : > { %v2594_v19 = vor.u32 %v2751_v16, %v2593_v9  ;;  %v2737_v9 = vld [vmem:[#allocation12 + $0x44] sm:$0xf]  ;;  %v2731_v57 = vld [vmem:[#allocation12 + $0xc] sm:$0xf0] }
 0x14c   : > { %1000 = vmatmul.bf16.gmra.mxu1 %v762_v17  ;;  %1366 = vmatpush.bf16.msra.mxu2 %v2610_v3  ;;  %v2749_v17 = vld [vmem:[#allocation12 + $0xa4] sm:$0xf] }
 0x14d   : > { %v2598_v27 = vor.u32 %v2749_v17, %v2595_v24  ;;  %v2547_v17 = vld [vmem:[#allocation12 + $0x50] sm:$0xf0]  ;;  %v2740_v24 = vld [vmem:[#allocation12 + $0x54] sm:$0xf0] }
 0x14f   : > { %1456 = vmatpush.bf16.msra.mxu3 %v2598_v27 }
 0x150   : > { %1367 = vmatpush.bf16.msra.mxu2 %v2594_v19  ;;  %v2553_v19 = vld [vmem:[#allocation12 + $0x48] sm:$0xf] }
 0x151   : > { %v703_v35 = vpop.f32.mrf.mxu0  ;;  %v2554_v27 = vor.u32 %v2740_v24, %v2553_v19  ;;  %v2768_v19 = vld [vmem:[#allocation13 + $0x38] sm:$0xff] }
 0x152   : > { %v2776_v24 = vld [vmem:[#allocation13 + $0x78] sm:$0xff] }
 0x153   : > { %1457 = vmatpush.bf16.msra.mxu3 %v2582_v41  ;;  %1548 = vmatpush.bf16.msrb.mxu0 %v2554_v27  ;;  %v2531_v41 = vld [vmem:[#allocation12 + $0x30] sm:$0xf0]  ;;  %v3608_v27 = vld [vmem:[%s4203_s5] ss:$0 sm:$0xff] }
 0x154   : > { %742 = vmatmul.bf16.gmra.mxu0 %v602_v34  ;;  %v491_v34 = vld [vmem:[%s3409_s0 + $0xf0] sm:$0xff]  ;;  %v2534_v52 = vor.u32 %v2733_v36, %v2531_v41 }
 0x155   : > { %v3589_v46 = vadd.f32 %v523_v37, %v491_v34  ;;  %v2529_v34 = vld [vmem:[#allocation12 + $0x20] sm:$0xf] }
 0x157   : > { %v587_v3 = vadd.f32 1.0, %v3589_v46  ;;  %1458 = vmatpush.bf16.msra.mxu3 %v2566_v1  ;;  %v2521_v1 = vld [vmem:[#allocation12 + $0x8] sm:$0xf] }
 0x159   : > { %v705_v51 = vpop.f32.mrf.mxu0  ;;  %v604_v29 = vpack.c.bf16 %v588_v4, %v587_v3  ;;  %v790_v3 = vlaneseq }
 0x15a   : > { %v763_v56 = vpack.c.bf16 %v705_v51, %v703_v35  ;;  %v2578_v35 = vor.u32 %v2747_v26, %v2577_v25  ;;  %v2743_v51 = vld [vmem:[#allocation12 + $0x6c] sm:$0xf0]  ;;  %v2742_v25 = vld [vmem:[#allocation12 + $0x6c] sm:$0xf]  ;;  %v2550_v26 = vor.u32 %v2737_v9, %v2547_v17 }
 0x15c   : > { %1005 = vmatmul.bf16.gmra.mxu1 %v763_v56  ;;  %1368 = vmatpush.bf16.msra.mxu2 %v2578_v35  ;;  %v2562_v56 = vor.u32 %v2743_v51, %v2561_v50  ;;  %v2735_v35 = vld [vmem:[#allocation12 + $0x2c] sm:$0xf0]  ;;  %v2537_v50 = vld [vmem:[#allocation12 + $0x28] sm:$0xf]  ;;  %v2736_v51 = vld [vmem:[#allocation12 + $0x34] sm:$0xf0] }
 0x15d   : > { %1459 = vmatpush.bf16.msra.mxu3 %v2550_v26  ;;  %v2530_v38 = vor.u32 %v2735_v35, %v2529_v34 }
 0x160   : > { %1369 = vmatpush.bf16.msra.mxu2 %v2562_v56  ;;  %v2513_v56 = vld [vmem:[#allocation12] sm:$0xf] }
 0x161   : > { %v708_v18 = vpop.f32.mrf.mxu0  ;;  %1460 = vmatpush.bf16.msra.mxu3 %v2534_v52  ;;  %v2514_v63 = vor.u32 %v2731_v57, %v2513_v56  ;;  %v2738_v56 = vld [vmem:[#allocation12 + $0x4c] sm:$0xf]  ;;  %v2555_v57 = vld [vmem:[#allocation12 + $0x58] sm:$0xf0] }
 0x164   : > { %747 = vmatmul.bf16.gmra.mxu0 %v603_v8  ;;  %v2739_v8 = vld [vmem:[#allocation12 + $0x4c] sm:$0xf0] }
 0x165   : > { %v2546_v16 = vor.u32 %v2739_v8, %v2545_v5  ;;  %v2522_v5 = vor.u32 %v2732_v2, %v2521_v1 }
 0x167   : > { %1370 = vmatpush.bf16.msra.mxu2 %v2546_v16  ;;  %v3599_v16 = vshrl.u32 %v790_v3, 7 }
 0x169   : > { %v710_v53 = vpop.f32.mrf.mxu0  ;;  %v823_v17 = vcvt.s32.f32 %v3599_v16 }
 0x16a   : > { %v764_v0 = vpack.c.bf16 %v710_v53, %v708_v18  ;;  %v2571_v18 = vld [vmem:[#allocation12 + $0x78] sm:$0xf0]  ;;  %v2538_v53 = vor.u32 %v2736_v51, %v2537_v50  ;;  %v793_v50 = vadd.s32 16, %v3599_v16 }
 0x16b   : > { %v2574_v28 = vor.u32 %v2742_v25, %v2571_v18  ;;  %1371 = vmatpush.bf16.msra.mxu2 %v2530_v38  ;;  %v3602_v25 = vstv %s460_s16 }
 0x16c   : > { %1010 = vmatmul.bf16.gmra.mxu1 %v764_v0  ;;  %1549 = vmatpush.bf16.msrb.mxu0 %v2538_v53  ;;  %v2515_v0 = vld [vmem:[#allocation12 + $0x10] sm:$0xf0]  ;;  %v856_v26 = vadd.f32 %v3602_v25, %v823_v17  ;;  %v825_v53 = vcvt.s32.f32 %v793_v50 }
 0x16d   : > { %1636 = vmatpush.bf16.msrb.mxu1 %v2574_v28  ;;  %v2518_v4 = vor.u32 %v2729_v62, %v2515_v0  ;;  %v792_v28 = vadd.s32 8, %v3599_v16  ;;  %v2558_v62 = vor.u32 %v2738_v56, %v2555_v57 }
 0x16e   : > { %v858_v2 = vadd.f32 %v3602_v25, %v825_v53 }
 0x16f   : > { %1372 = vmatpush.bf16.msra.mxu2 %v2514_v63  ;;  %1461 = vmatpush.bf16.msra.mxu3 %v2518_v4  ;;  %v824_v34 = vcvt.s32.f32 %v792_v28 }
 0x170   : > { %1550 = vmatpush.bf16.msrb.mxu0 %v2522_v5 }
 0x171   : > { %v713_v37 = vpop.f32.mrf.mxu0  ;;  %v857_v41 = vadd.f32 %v3602_v25, %v824_v34  ;;  %1637 = vmatpush.bf16.msrb.mxu1 %v2558_v62 }
 0x173   : > { %2009 = vmatpush.bf16.msrb.mxu2 %v2768_v19  ;;  %2098 = vmatpush.bf16.msrb.mxu3 %v2776_v24  ;;  %v893_v52 = vmul.f32 %v3608_v27, %v857_v41 }
 0x174   : > { %752 = vmatmul.bf16.gmra.mxu0 %v604_v29  ;;  %v892_v29 = vmul.f32 %v3608_v27, %v856_v26 }
 0x179   : > { %v715_v8 = vpop.f32.mrf.mxu0 }
 0x17a   : > { %v765_v9 = vpack.c.bf16 %v715_v8, %v713_v37  ;;  %v894_v8 = vmul.f32 %v3608_v27, %v858_v2 }
 0x17c   : > { %1015 = vmatmul.bf16.gmra.mxu1 %v765_v9 }
 0x181   : > { %v718_v18 = vpop.f32.mrf.mxu0 }
 0x189   : > { %v720_v35 = vpop.f32.mrf.mxu0  ;;  %v981_v36 = vpop.f32.mrf.mxu1 }
 0x18a   : > { %v982_v37 = vadd.f32 %v981_v36, %v892_v29  ;;  %v766_v38 = vpack.c.bf16 %v720_v35, %v718_v18  ;;  %v2767_v36 = vld [vmem:[#allocation13 + $0x30] sm:$0xff] }
 0x18b   : > { %2010 = vmatpush.bf16.msrb.mxu2 %v2767_v36 }
 0x18c   : > { %v1061_v51 = vadd.f32 %v982_v37, %v3439_v10  ;;  %1020 = vmatmul.bf16.gmra.mxu1 %v766_v38  ;;  %v794_v10 = vadd.s32 24, %v3599_v16  ;;  %v2775_v37 = vld [vmem:[#allocation13 + $0x70] sm:$0xff] }
 0x18d   : > { %2099 = vmatpush.bf16.msrb.mxu3 %v2775_v37 }
 0x18e   : > { %1093 = vst [vmem:[%s3616_s3] sm:$0xff] %v1061_v51  ;;  %v1125_v4 = vadd.f32 1.0, %v1061_v51  ;;  %v826_v9 = vcvt.s32.f32 %v794_v10 }
 0x190   : > { %v859_v28 = vadd.f32 %v3602_v25, %v826_v9  ;;  %v2734_v9 = vld [vmem:[#allocation12 + $0x2c] sm:$0xf] }
 0x191   : > { %v723_v63 = vpop.f32.mrf.mxu0  ;;  %v983_v0 = vpop.f32.mrf.mxu1 }
 0x192   : > { %v984_v1 = vadd.f32 %v983_v0, %v893_v52  ;;  %v895_v34 = vmul.f32 %v3608_v27, %v859_v28  ;;  %v796_v52 = vadd.s32 40, %v3599_v16 }
 0x194   : > { %v1062_v3 = vadd.f32 %v984_v1, %v3441_v11  ;;  %v795_v11 = vadd.s32 32, %v3599_v16  ;;  %v828_v62 = vcvt.s32.f32 %v796_v52 }
 0x196   : > { %1094 = vst [vmem:[%s3616_s3 + $0x8] sm:$0xff] %v1062_v3  ;;  %v1126_v5 = vadd.f32 1.0, %v1062_v3  ;;  %v827_v35 = vcvt.s32.f32 %v795_v11  ;;  %v861_v3 = vadd.f32 %v3602_v25, %v828_v62  ;;  %v2766_v62 = vld [vmem:[#allocation13 + $0x28] sm:$0xff] }
 0x197   : > { %2011 = vmatpush.bf16.msrb.mxu2 %v2766_v62 }
 0x198   : > { %v3625_v17 = vpack.c.bf16 %v1126_v5, %v1125_v4  ;;  %v860_v51 = vadd.f32 %v3602_v25, %v827_v35  ;;  %v897_v5 = vmul.f32 %v3608_v27, %v861_v3 }
 0x199   : > { %v725_v19 = vpop.f32.mrf.mxu0  ;;  %v986_v24 = vpop.f32.mrf.mxu1 }
 0x19a   : > { %v987_v18 = vadd.f32 %v986_v24, %v894_v8  ;;  %1373 = vmatmul.bf16.vlgmr.msra.gmra.mxu2 %v3625_v17  ;;  %1462 = vmatmul.bf16.vlgmr.msra.gmra.mxu3 %v3625_v17  ;;  %v767_v26 = vpack.c.bf16 %v725_v19, %v723_v63  ;;  %v896_v57 = vmul.f32 %v3608_v27, %v860_v51  ;;  %v2539_v19 = vld [vmem:[#allocation12 + $0x38] sm:$0xf0] }
 0x19b   : > { %1551 = vmatmul.bf16.vlgmr.msrb.gmra.mxu0 %v3625_v17  ;;  %v2542_v24 = vor.u32 %v2734_v9, %v2539_v19 }
 0x19c   : > { %v1063_v29 = vadd.f32 %v987_v18, %v3449_v21  ;;  %1025 = vmatmul.bf16.gmra.mxu1 %v767_v26 }
 0x19d   : > { %1638 = vmatpush.bf16.msrb.mxu1 %v2542_v24 }
 0x19e   : > { %1095 = vst [vmem:[%s3616_s3 + $0x10] sm:$0xff] %v1063_v29  ;;  %v1127_v21 = vadd.f32 1.0, %v1063_v29  ;;  %v798_v29 = vadd.s32 56, %v3599_v16 }
 0x1a0   : > { %v830_v37 = vcvt.s32.f32 %v798_v29 }
 0x1a1   : > { %v728_v38 = vpop.f32.mrf.mxu0  ;;  %v988_v41 = vpop.f32.mrf.mxu1 }
 0x1a2   : > { %v989_v50 = vadd.f32 %v988_v41, %v895_v34 }
 0x1a4   : > { %v1064_v53 = vadd.f32 %v989_v50, %v3451_v22  ;;  %v797_v22 = vadd.s32 48, %v3599_v16 }
 0x1a6   : > { %1096 = vst [vmem:[%s3616_s3 + $0x18] sm:$0xff] %v1064_v53  ;;  %v1128_v56 = vadd.f32 1.0, %v1064_v53  ;;  %v829_v8 = vcvt.s32.f32 %v797_v22  ;;  %v863_v53 = vadd.f32 %v3602_v25, %v830_v37  ;;  %v800_v22 = vadd.s32 72, %v3599_v16 }
 0x1a8   : > { %v3640_v63 = vpack.c.bf16 %v1128_v56, %v1127_v21  ;;  %v862_v11 = vadd.f32 %v3602_v25, %v829_v8  ;;  %v899_v56 = vmul.f32 %v3608_v27, %v863_v53  ;;  %v832_v9 = vcvt.s32.f32 %v800_v22 }
 0x1a9   : > { %v730_v0 = vpop.f32.mrf.mxu0  ;;  %v991_v1 = vpop.f32.mrf.mxu1  ;;  %v802_v53 = vadd.s32 88, %v3599_v16 }
 0x1aa   : > { %v992_v2 = vadd.f32 %v991_v1, %v896_v57  ;;  %1378 = vmatmul.bf16.gmra.mxu2 %v3640_v63  ;;  %1467 = vmatmul.bf16.gmra.mxu3 %v3640_v63  ;;  %v768_v10 = vpack.c.bf16 %v730_v0, %v728_v38  ;;  %v898_v36 = vmul.f32 %v3608_v27, %v862_v11  ;;  %v2774_v0 = vld [vmem:[#allocation13 + $0x68] sm:$0xff] }
 0x1ab   : > { %1556 = vmatmul.bf16.gmra.mxu0 %v3640_v63  ;;  %2100 = vmatpush.bf16.msrb.mxu3 %v2774_v0  ;;  %v865_v11 = vadd.f32 %v3602_v25, %v832_v9 }
 0x1ac   : > { %v1065_v4 = vadd.f32 %v992_v2, %v3459_v30  ;;  %1030 = vmatmul.bf16.gmra.mxu1 %v768_v10 }
 0x1ae   : > { %1097 = vst [vmem:[%s3616_s3 + $0x20] sm:$0xff] %v1065_v4  ;;  %v1129_v30 = vadd.f32 1.0, %v1065_v4 }
 0x1b1   : > { %v733_v18 = vpop.f32.mrf.mxu0  ;;  %v993_v26 = vpop.f32.mrf.mxu1 }
 0x1b2   : > { %v994_v28 = vadd.f32 %v993_v26, %v897_v5 }
 0x1b4   : > { %v1066_v34 = vadd.f32 %v994_v28, %v3461_v31  ;;  %v799_v31 = vadd.s32 64, %v3599_v16 }
 0x1b6   : > { %1098 = vst [vmem:[%s3616_s3 + $0x28] sm:$0xff] %v1066_v34  ;;  %v1130_v35 = vadd.f32 1.0, %v1066_v34  ;;  %v831_v57 = vcvt.s32.f32 %v799_v31  ;;  %v901_v34 = vmul.f32 %v3608_v27, %v865_v11 }
 0x1b8   : > { %v3655_v38 = vpack.c.bf16 %v1130_v35, %v1129_v30  ;;  %v864_v3 = vadd.f32 %v3602_v25, %v831_v57  ;;  %v2730_v35 = vld [vmem:[#allocation12 + $0xc] sm:$0xf]  ;;  %v834_v57 = vcvt.s32.f32 %v802_v53 }
 0x1b9   : > { %v735_v41 = vpop.f32.mrf.mxu0  ;;  %v996_v50 = vpop.f32.mrf.mxu1 }
 0x1ba   : > { %v997_v51 = vadd.f32 %v996_v50, %v898_v36  ;;  %1383 = vmatmul.bf16.gmra.mxu2 %v3655_v38  ;;  %1472 = vmatmul.bf16.gmra.mxu3 %v3655_v38  ;;  %v769_v52 = vpack.c.bf16 %v735_v41, %v733_v18  ;;  %v900_v8 = vmul.f32 %v3608_v27, %v864_v3  ;;  %v2523_v36 = vld [vmem:[#allocation12 + $0x18] sm:$0xf0] }
 0x1bb   : > { %1561 = vmatmul.bf16.gmra.mxu0 %v3655_v38  ;;  %v2526_v37 = vor.u32 %v2730_v35, %v2523_v36  ;;  %v867_v3 = vadd.f32 %v3602_v25, %v834_v57  ;;  %v806_v57 = vadd.s32 120, %v3599_v16 }
 0x1bc   : > { %v1067_v21 = vadd.f32 %v997_v51, %v3469_v39  ;;  %1035 = vmatmul.bf16.gmra.mxu1 %v769_v52 }
 0x1bd   : > { %1639 = vmatpush.bf16.msrb.mxu1 %v2526_v37 }
 0x1be   : > { %1099 = vst [vmem:[%s3616_s3 + $0x30] sm:$0xff] %v1067_v21  ;;  %v1131_v39 = vadd.f32 1.0, %v1067_v21 }
 0x1c1   : > { %v738_v1 = vpop.f32.mrf.mxu0  ;;  %v998_v2 = vpop.f32.mrf.mxu1 }
 0x1c2   : > { %v999_v10 = vadd.f32 %v998_v2, %v899_v56 }
 0x1c4   : > { %v1068_v4 = vadd.f32 %v999_v10, %v3471_v40  ;;  %v801_v40 = vadd.s32 80, %v3599_v16 }
 0x1c6   : > { %1100 = vst [vmem:[%s3616_s3 + $0x38] sm:$0xff] %v1068_v4  ;;  %v1132_v5 = vadd.f32 1.0, %v1068_v4  ;;  %v833_v30 = vcvt.s32.f32 %v801_v40  ;;  %v903_v4 = vmul.f32 %v3608_v27, %v867_v3 }
 0x1c8   : > { %v3670_v19 = vpack.c.bf16 %v1132_v5, %v1131_v39  ;;  %v866_v52 = vadd.f32 %v3602_v25, %v833_v30  ;;  %v2765_v5 = vld [vmem:[#allocation13 + $0x20] sm:$0xff] }
 0x1c9   : > { %v740_v24 = vpop.f32.mrf.mxu0  ;;  %v1001_v18 = vpop.f32.mrf.mxu1  ;;  %2012 = vmatpush.bf16.msrb.mxu2 %v2765_v5 }
 0x1ca   : > { %v770_v26 = vpack.c.bf16 %v740_v24, %v738_v1  ;;  %v1002_v28 = vadd.f32 %v1001_v18, %v900_v8  ;;  %1388 = vmatmul.bf16.gmra.mxu2 %v3670_v19  ;;  %1477 = vmatmul.bf16.gmra.mxu3 %v3670_v19  ;;  %v902_v56 = vmul.f32 %v3608_v27, %v866_v52  ;;  %v2773_v8 = vld [vmem:[#allocation13 + $0x60] sm:$0xff] }
 0x1cb   : > { %1566 = vmatmul.bf16.gmra.mxu0 %v3670_v19  ;;  %2101 = vmatpush.bf16.msrb.mxu3 %v2773_v8 }
 0x1cc   : > { %v1069_v29 = vadd.f32 %v1002_v28, %v3479_v48  ;;  %1040 = vmatmul.bf16.gmra.mxu1 %v770_v26  ;;  %v804_v28 = vadd.s32 104, %v3599_v16 }
 0x1ce   : > { %1101 = vst [vmem:[%s3616_s3 + $0x40] sm:$0xff] %v1069_v29  ;;  %v1133_v48 = vadd.f32 1.0, %v1069_v29 }
 0x1d1   : > { %v743_v41 = vpop.f32.mrf.mxu0  ;;  %v1003_v50 = vpop.f32.mrf.mxu1 }
 0x1d2   : > { %v1004_v51 = vadd.f32 %v1003_v50, %v901_v34  ;;  %v836_v34 = vcvt.s32.f32 %v804_v28  ;;  %v805_v50 = vadd.s32 112, %v3599_v16 }
 0x1d4   : > { %v1070_v31 = vadd.f32 %v1004_v51, %v3481_v49  ;;  %v803_v49 = vadd.s32 96, %v3599_v16  ;;  %v837_v53 = vcvt.s32.f32 %v805_v50 }
 0x1d6   : > { %1102 = vst [vmem:[%s3616_s3 + $0x48] sm:$0xff] %v1070_v31  ;;  %v1134_v21 = vadd.f32 1.0, %v1070_v31  ;;  %v835_v39 = vcvt.s32.f32 %v803_v49 }
 0x1d8   : > { %v3685_v62 = vpack.c.bf16 %v1134_v21, %v1133_v48  ;;  %v868_v26 = vadd.f32 %v3602_v25, %v835_v39 }
 0x1d9   : > { %v745_v0 = vpop.f32.mrf.mxu0  ;;  %v1006_v1 = vpop.f32.mrf.mxu1 }
 0x1da   : > { %v771_v2 = vpack.c.bf16 %v745_v0, %v743_v41  ;;  %v1007_v10 = vadd.f32 %v1006_v1, %v902_v56  ;;  %1393 = vmatmul.bf16.gmra.mxu2 %v3685_v62  ;;  %1482 = vmatmul.bf16.gmra.mxu3 %v3685_v62  ;;  %v904_v29 = vmul.f32 %v3608_v27, %v868_v26  ;;  %v2772_v26 = vld [vmem:[#allocation13 + $0x58] sm:$0xff] }
 0x1db   : > { %1571 = vmatmul.bf16.gmra.mxu0 %v3685_v62  ;;  %v870_v56 = vadd.f32 %v3602_v25, %v837_v53  ;;  %2102 = vmatpush.bf16.msrb.mxu3 %v2772_v26  ;;  %v2771_v26 = vld [vmem:[#allocation13 + $0x50] sm:$0xff] }
 0x1dc   : > { %v1071_v22 = vadd.f32 %v1007_v10, %v3489_v59  ;;  %1045 = vmatmul.bf16.gmra.mxu1 %v771_v2  ;;  %v838_v10 = vcvt.s32.f32 %v806_v57 }
 0x1de   : > { %1103 = vst [vmem:[%s3616_s3 + $0x50] sm:$0xff] %v1071_v22  ;;  %v1135_v59 = vadd.f32 1.0, %v1071_v22  ;;  %v871_v5 = vadd.f32 %v3602_v25, %v838_v10 }
 0x1df   : > { %2103 = vmatpush.bf16.msrb.mxu3 %v2771_v26 }
 0x1e1   : > { %v748_v9 = vpop.f32.mrf.mxu0  ;;  %v1008_v24 = vpop.f32.mrf.mxu1 }
 0x1e2   : > { %v1009_v18 = vadd.f32 %v1008_v24, %v903_v4 }
 0x1e4   : > { %v1072_v11 = vadd.f32 %v1009_v18, %v3491_v60  ;;  %v869_v60 = vadd.f32 %v3602_v25, %v836_v34  ;;  %v2764_v18 = vld [vmem:[#allocation13 + $0x18] sm:$0xff] }
 0x1e5   : > { %2013 = vmatpush.bf16.msrb.mxu2 %v2764_v18  ;;  %v2763_v18 = vld [vmem:[#allocation13 + $0x10] sm:$0xff] }
 0x1e6   : > { %1104 = vst [vmem:[%s3616_s3 + $0x58] sm:$0xff] %v1072_v11  ;;  %v1136_v40 = vadd.f32 1.0, %v1072_v11  ;;  %v905_v52 = vmul.f32 %v3608_v27, %v869_v60 }
 0x1e8   : > { %v3700_v30 = vpack.c.bf16 %v1136_v40, %v1135_v59  ;;  %v808_v40 = vadd.s32 136, %v3599_v16 }
 0x1e9   : > { %v750_v35 = vpop.f32.mrf.mxu0  ;;  %v1011_v36 = vpop.f32.mrf.mxu1  ;;  %2014 = vmatpush.bf16.msrb.mxu2 %v2763_v18 }
 0x1ea   : > { %v772_v37 = vpack.c.bf16 %v750_v35, %v748_v9  ;;  %v1012_v41 = vadd.f32 %v1011_v36, %v904_v29  ;;  %1398 = vmatmul.bf16.gmra.mxu2 %v3700_v30  ;;  %1487 = vmatmul.bf16.gmra.mxu3 %v3700_v30  ;;  %v907_v9 = vmul.f32 %v3608_v27, %v871_v5  ;;  %v840_v36 = vcvt.s32.f32 %v808_v40 }
 0x1eb   : > { %1576 = vmatmul.bf16.gmra.mxu0 %v3700_v30 }
 0x1ec   : > { %v1073_v51 = vadd.f32 %v1012_v41, %v3499_v6  ;;  %1050 = vmatmul.bf16.gmra.mxu1 %v772_v37  ;;  %v906_v6 = vmul.f32 %v3608_v27, %v870_v56  ;;  %v873_v50 = vadd.f32 %v3602_v25, %v840_v36  ;;  %v810_v56 = vadd.s32 152, %v3599_v16 }
 0x1ee   : > { %1105 = vst [vmem:[%s3616_s3 + $0x60] sm:$0xff] %v1073_v51  ;;  %v1137_v1 = vadd.f32 1.0, %v1073_v51 }
 0x1f1   : > { %v753_v31 = vpop.f32.mrf.mxu0  ;;  %v1013_v48 = vpop.f32.mrf.mxu1 }
 0x1f2   : > { %v1014_v21 = vadd.f32 %v1013_v48, %v905_v52  ;;  %v909_v52 = vmul.f32 %v3608_v27, %v873_v50 }
 0x1f4   : > { %v1074_v0 = vadd.f32 %v1014_v21, %v3501_v7  ;;  %v807_v7 = vadd.s32 128, %v3599_v16 }
 0x1f6   : > { %1106 = vst [vmem:[%s3616_s3 + $0x68] sm:$0xff] %v1074_v0  ;;  %v1138_v2 = vadd.f32 1.0, %v1074_v0  ;;  %v839_v24 = vcvt.s32.f32 %v807_v7 }
 0x1f8   : > { %v3715_v3 = vpack.c.bf16 %v1138_v2, %v1137_v1  ;;  %v872_v59 = vadd.f32 %v3602_v25, %v839_v24 }
 0x1f9   : > { %v755_v49 = vpop.f32.mrf.mxu0  ;;  %v1016_v22 = vpop.f32.mrf.mxu1 }
 0x1fa   : > { %v773_v4 = vpack.c.bf16 %v755_v49, %v753_v31  ;;  %v1017_v39 = vadd.f32 %v1016_v22, %v906_v6  ;;  %1403 = vmatmul.bf16.gmra.mxu2 %v3715_v3  ;;  %1492 = vmatmul.bf16.gmra.mxu3 %v3715_v3  ;;  %v908_v35 = vmul.f32 %v3608_v27, %v872_v59  ;;  %v811_v49 = vadd.s32 160, %v3599_v16 }
 0x1fb   : > { %1581 = vmatmul.bf16.gmra.mxu0 %v3715_v3 }
 0x1fc   : > { %v1075_v8 = vadd.f32 %v1017_v39, %v3509_v20  ;;  %1055 = vmatmul.bf16.gmra.mxu1 %v773_v4 }
 0x1fe   : > { %1107 = vst [vmem:[%s3616_s3 + $0x70] sm:$0xff] %v1075_v8  ;;  %v1139_v34 = vadd.f32 1.0, %v1075_v8  ;;  %v843_v8 = vcvt.s32.f32 %v811_v49 }
 0x201   : > { %v1018_v28 = vpop.f32.mrf.mxu1 }
 0x202   : > { %v1019_v11 = vadd.f32 %v1018_v28, %v907_v9 }
 0x204   : > { %v1076_v29 = vadd.f32 %v1019_v11, %v3511_v23  ;;  %v809_v23 = vadd.s32 144, %v3599_v16 }
 0x206   : > { %1108 = vst [vmem:[%s3616_s3 + $0x78] sm:$0xff] %v1076_v29  ;;  %v1140_v20 = vadd.f32 1.0, %v1076_v29  ;;  %v841_v53 = vcvt.s32.f32 %v809_v23 }
 0x208   : > { %v3730_v37 = vpack.c.bf16 %v1140_v20, %v1139_v34  ;;  %v874_v21 = vadd.f32 %v3602_v25, %v841_v53 }
 0x209   : > { %v1021_v41 = vpop.f32.mrf.mxu1 }
 0x20a   : > { %v1022_v60 = vadd.f32 %v1021_v41, %v908_v35  ;;  %1408 = vmatmul.bf16.gmra.mxu2 %v3730_v37  ;;  %1497 = vmatmul.bf16.gmra.mxu3 %v3730_v37  ;;  %v910_v2 = vmul.f32 %v3608_v27, %v874_v21 }
 0x20b   : > { %1586 = vmatmul.bf16.gmra.mxu0 %v3730_v37 }
 0x20c   : > { %v1077_v51 = vadd.f32 %v1022_v60, %v3519_v42  ;;  %1640 = vmatmul.bf16.vlgmr.msrb.gmra.mxu1 %v3625_v17  ;;  %v842_v42 = vcvt.s32.f32 %v810_v56 }
 0x20e   : > { %1109 = vst [vmem:[%s3616_s3 + $0x80] sm:$0xff] %v1077_v51  ;;  %v1141_v0 = vadd.f32 1.0, %v1077_v51 }
 0x211   : > { %v1023_v31 = vpop.f32.mrf.mxu1 }
 0x212   : > { %v1024_v48 = vadd.f32 %v1023_v31, %v909_v52 }
 0x214   : > { %v1078_v57 = vadd.f32 %v1024_v48, %v3521_v43  ;;  %v875_v43 = vadd.f32 %v3602_v25, %v842_v42 }
 0x216   : > { %1110 = vst [vmem:[%s3616_s3 + $0x88] sm:$0xff] %v1078_v57  ;;  %v1142_v1 = vadd.f32 1.0, %v1078_v57  ;;  %v911_v24 = vmul.f32 %v3608_v27, %v875_v43  ;;  %v814_v43 = vadd.s32 184, %v3599_v16 }
 0x218   : > { %v1552_v17 = vpop.f32.mrf.mxu0  ;;  %v3746_v6 = vpack.c.bf16 %v1142_v1, %v1141_v0  ;;  %v846_v26 = vcvt.s32.f32 %v814_v43 }
 0x219   : > { %v1026_v10 = vpop.f32.mrf.mxu1  ;;  %v1721_v4 = vmax.f32 %v1552_v17, 0.0 }
 0x21a   : > { %v1027_v22 = vadd.f32 %v1026_v10, %v910_v2  ;;  %1413 = vmatmul.bf16.gmra.mxu2 %v3746_v6  ;;  %1502 = vmatmul.bf16.gmra.mxu3 %v3746_v6 }
 0x21b   : > { %1591 = vmatmul.bf16.gmra.mxu0 %v3746_v6 }
 0x21c   : > { %v1079_v39 = vadd.f32 %v1027_v22, %v3529_v54  ;;  %1645 = vmatmul.bf16.gmra.mxu1 %v3640_v63  ;;  %v876_v54 = vadd.f32 %v3602_v25, %v843_v8  ;;  %v812_v63 = vadd.s32 168, %v3599_v16 }
 0x21d   : > { %v1374_v5 = vpop.f32.mrf.mxu2  ;;  %v3755_v7 = vpop.f32.mrf.mxu3 }
 0x21e   : > { %1111 = vst [vmem:[%s3616_s3 + $0x90] sm:$0xff] %v1079_v39  ;;  %v3758_v9 = vmul.f32 %v1721_v4, %v1374_v5  ;;  %v912_v35 = vmul.f32 %v3608_v27, %v876_v54  ;;  %v1143_v36 = vadd.f32 1.0, %v1079_v39  ;;  %v844_v50 = vcvt.s32.f32 %v812_v63 }
 0x220   : > { %v1554_v28 = vpop.f32.mrf.mxu0  ;;  %v877_v48 = vadd.f32 %v3602_v25, %v844_v50 }
 0x221   : > { %v1028_v11 = vpop.f32.mrf.mxu1  ;;  %v1723_v40 = vmax.f32 %v1554_v28, 0.0 }
 0x222   : > { %v1029_v59 = vadd.f32 %v1028_v11, %v911_v24  ;;  %v913_v42 = vmul.f32 %v3608_v27, %v877_v48 }
 0x224   : > { %v1080_v29 = vadd.f32 %v1029_v59, %v3531_v55  ;;  %v813_v55 = vadd.s32 176, %v3599_v16 }
 0x225   : > { %v1376_v34 = vpop.f32.mrf.mxu2  ;;  %v3764_v20 = vpop.f32.mrf.mxu3 }
 0x226   : > { %1112 = vst [vmem:[%s3616_s3 + $0x98] sm:$0xff] %v1080_v29  ;;  %v1144_v41 = vadd.f32 1.0, %v1080_v29  ;;  %v3768_v60 = vmul.f32 %v1723_v40, %v1376_v34  ;;  %v845_v1 = vcvt.s32.f32 %v813_v55  ;;  %v879_v40 = vadd.f32 %v3602_v25, %v846_v26  ;;  %v2770_v55 = vld [vmem:[#allocation13 + $0x48] sm:$0xff] }
 0x227   : > { %2104 = vmatpush.bf16.msrb.mxu3 %v2770_v55 }
 0x228   : > { %v1849_v23 = vpack.c.bf16 %v3768_v60, %v3758_v9  ;;  %v1557_v51 = vpop.f32.mrf.mxu0  ;;  %v3772_v52 = vpack.c.bf16 %v1144_v41, %v1143_v36  ;;  %v878_v49 = vadd.f32 %v3602_v25, %v845_v1 }
 0x229   : > { %v1031_v53 = vpop.f32.mrf.mxu1  ;;  %v1725_v21 = vmax.f32 %v1557_v51, 0.0  ;;  %v915_v51 = vmul.f32 %v3608_v27, %v879_v40 }
 0x22a   : > { %v1032_v31 = vadd.f32 %v1031_v53, %v912_v35  ;;  %1418 = vmatmul.bf16.gmra.mxu2 %v3772_v52  ;;  %1507 = vmatmul.bf16.gmra.mxu3 %v3772_v52  ;;  %v914_v5 = vmul.f32 %v3608_v27, %v878_v49  ;;  %v2762_v53 = vld [vmem:[#allocation13 + $0x8] sm:$0xff] }
 0x22b   : > { %1596 = vmatmul.bf16.gmra.mxu0 %v3772_v52  ;;  %2015 = vmatpush.bf16.msrb.mxu2 %v2762_v53  ;;  %v818_v53 = vadd.s32 216, %v3599_v16 }
 0x22c   : > { %v1081_v56 = vadd.f32 %v1032_v31, %v3539_v14  ;;  %1650 = vmatmul.bf16.gmra.mxu1 %v3655_v38 }
 0x22d   : > { %v1379_v57 = vpop.f32.mrf.mxu2  ;;  %v3781_v0 = vpop.f32.mrf.mxu3 }
 0x22e   : > { %1113 = vst [vmem:[%s3616_s3 + $0xa0] sm:$0xff] %v1081_v56  ;;  %v3784_v2 = vmul.f32 %v1725_v21, %v1379_v57  ;;  %v1145_v8 = vadd.f32 1.0, %v1081_v56 }
 0x230   : > { %v1559_v17 = vpop.f32.mrf.mxu0 }
 0x231   : > { %v1033_v10 = vpop.f32.mrf.mxu1  ;;  %v1727_v14 = vmax.f32 %v1559_v17, 0.0 }
 0x232   : > { %v1034_v22 = vadd.f32 %v1033_v10, %v913_v42 }
 0x234   : > { %v1082_v38 = vadd.f32 %v1034_v22, %v3541_v15  ;;  %v815_v15 = vadd.s32 192, %v3599_v16 }
 0x235   : > { %v1381_v4 = vpop.f32.mrf.mxu2  ;;  %v3790_v39 = vpop.f32.mrf.mxu3 }
 0x236   : > { %1114 = vst [vmem:[%s3616_s3 + $0xa8] sm:$0xff] %v1082_v38  ;;  %v1146_v24 = vadd.f32 1.0, %v1082_v38  ;;  %v3794_v18 = vmul.f32 %v1727_v14, %v1381_v4  ;;  %v847_v41 = vcvt.s32.f32 %v815_v15 }
 0x238   : > { %v1851_v28 = vpack.c.bf16 %v3794_v18, %v3784_v2  ;;  %v1562_v11 = vpop.f32.mrf.mxu0  ;;  %v3798_v54 = vpack.c.bf16 %v1146_v24, %v1145_v8 }
 0x239   : > { %v1036_v59 = vpop.f32.mrf.mxu1  ;;  %v1729_v29 = vmax.f32 %v1562_v11, 0.0 }
 0x23a   : > { %v1037_v63 = vadd.f32 %v1036_v59, %v914_v5  ;;  %1423 = vmatmul.bf16.gmra.mxu2 %v3798_v54  ;;  %1512 = vmatmul.bf16.gmra.mxu3 %v3798_v54 }
 0x23b   : > { %1601 = vmatmul.bf16.gmra.mxu0 %v3798_v54 }
 0x23c   : > { %v1083_v34 = vadd.f32 %v1037_v63, %v3549_v32  ;;  %1655 = vmatmul.bf16.gmra.mxu1 %v3670_v19  ;;  %v880_v32 = vadd.f32 %v3602_v25, %v847_v41  ;;  %v816_v19 = vadd.s32 200, %v3599_v16 }
 0x23d   : > { %v1384_v35 = vpop.f32.mrf.mxu2  ;;  %v3807_v36 = vpop.f32.mrf.mxu3 }
 0x23e   : > { %1115 = vst [vmem:[%s3616_s3 + $0xb0] sm:$0xff] %v1083_v34  ;;  %v3810_v50 = vmul.f32 %v1729_v29, %v1384_v35  ;;  %v916_v17 = vmul.f32 %v3608_v27, %v880_v32  ;;  %v1147_v10 = vadd.f32 1.0, %v1083_v34  ;;  %v848_v43 = vcvt.s32.f32 %v816_v19 }
 0x240   : > { %v1564_v31 = vpop.f32.mrf.mxu0  ;;  %v881_v24 = vadd.f32 %v3602_v25, %v848_v43 }
 0x241   : > { %v1038_v48 = vpop.f32.mrf.mxu1  ;;  %v1731_v56 = vmax.f32 %v1564_v31, 0.0 }
 0x242   : > { %v1039_v21 = vadd.f32 %v1038_v48, %v915_v51  ;;  %v917_v29 = vmul.f32 %v3608_v27, %v881_v24 }
 0x244   : > { %v1084_v57 = vadd.f32 %v1039_v21, %v3551_v33  ;;  %v817_v33 = vadd.s32 208, %v3599_v16 }
 0x245   : > { %v1386_v1 = vpop.f32.mrf.mxu2  ;;  %v3816_v42 = vpop.f32.mrf.mxu3 }
 0x246   : > { %1116 = vst [vmem:[%s3616_s3 + $0xb8] sm:$0xff] %v1084_v57  ;;  %v1148_v49 = vadd.f32 1.0, %v1084_v57  ;;  %v3820_v22 = vmul.f32 %v1731_v56, %v1386_v1  ;;  %v849_v63 = vcvt.s32.f32 %v817_v33  ;;  %v850_v56 = vcvt.s32.f32 %v818_v53 }
 0x248   : > { %v1853_v14 = vpack.c.bf16 %v3820_v22, %v3810_v50  ;;  %v1567_v38 = vpop.f32.mrf.mxu0  ;;  %v3824_v4 = vpack.c.bf16 %v1148_v49, %v1147_v10  ;;  %v882_v41 = vadd.f32 %v3602_v25, %v849_v63  ;;  %v883_v43 = vadd.f32 %v3602_v25, %v850_v56 }
 0x249   : > { %v1041_v5 = vpop.f32.mrf.mxu1  ;;  %v1733_v26 = vmax.f32 %v1567_v38, 0.0 }
 0x24a   : > { %v1042_v8 = vadd.f32 %v1041_v5, %v916_v17  ;;  %1428 = vmatmul.bf16.gmra.mxu2 %v3824_v4  ;;  %1517 = vmatmul.bf16.gmra.mxu3 %v3824_v4  ;;  %v918_v48 = vmul.f32 %v3608_v27, %v882_v41  ;;  %v919_v24 = vmul.f32 %v3608_v27, %v883_v43 }
 0x24b   : > { %1606 = vmatmul.bf16.gmra.mxu0 %v3824_v4 }
 0x24c   : > { %v1085_v11 = vadd.f32 %v1042_v8, %v3559_v58  ;;  %1660 = vmatmul.bf16.gmra.mxu1 %v3685_v62 }
 0x24d   : > { %v1389_v59 = vpop.f32.mrf.mxu2  ;;  %v3833_v15 = vpop.f32.mrf.mxu3 }
 0x24e   : > { %1117 = vst [vmem:[%s3616_s3 + $0xc0] sm:$0xff] %v1085_v11  ;;  %v3836_v40 = vmul.f32 %v1733_v26, %v1389_v59  ;;  %v1149_v32 = vadd.f32 1.0, %v1085_v11  ;;  %v2761_v26 = vld [vmem:[#allocation13] sm:$0xff] }
 0x24f   : > { %v2769_v11 = vld [vmem:[#allocation13 + $0x40] sm:$0xff]  ;;  %2016 = vmatpush.bf16.msrb.mxu2 %v2761_v26 }
 0x250   : > { %v1569_v34 = vpop.f32.mrf.mxu0  ;;  %2105 = vmatpush.bf16.msrb.mxu3 %v2769_v11 }
 0x251   : > { %v1043_v35 = vpop.f32.mrf.mxu1  ;;  %v1735_v58 = vmax.f32 %v1569_v34, 0.0 }
 0x252   : > { %v1044_v51 = vadd.f32 %v1043_v35, %v917_v29 }
 0x254   : > { %v1086_v62 = vadd.f32 %v1044_v51, %v3561_v61  ;;  %v819_v61 = vadd.s32 224, %v3599_v16 }
 0x255   : > { %v1391_v55 = vpop.f32.mrf.mxu2  ;;  %v3842_v31 = vpop.f32.mrf.mxu3 }
 0x256   : > { %1118 = vst [vmem:[%s3616_s3 + $0xc8] sm:$0xff] %v1086_v62  ;;  %v1150_v21 = vadd.f32 1.0, %v1086_v62  ;;  %v3846_v19 = vmul.f32 %v1735_v58, %v1391_v55  ;;  %v851_v8 = vcvt.s32.f32 %v819_v61  ;;  %v821_v61 = vadd.s32 240, %v3599_v16 }
 0x258   : > { %v1855_v57 = vpack.c.bf16 %v3846_v19, %v3836_v40  ;;  %v1572_v1 = vpop.f32.mrf.mxu0  ;;  %v3850_v17 = vpack.c.bf16 %v1150_v21, %v1149_v32  ;;  %v884_v29 = vadd.f32 %v3602_v25, %v851_v8 }
 0x259   : > { %v1046_v10 = vpop.f32.mrf.mxu1 }
 0x25a   : > { %v1047_v49 = vadd.f32 %v1046_v10, %v918_v48  ;;  %1433 = vmatmul.bf16.gmra.mxu2 %v3850_v17  ;;  %1522 = vmatmul.bf16.gmra.mxu3 %v3850_v17  ;;  %v920_v58 = vmul.f32 %v3608_v27, %v884_v29  ;;  %v822_v29 = vadd.s32 248, %v3599_v16 }
 0x25b   : > { %1611 = vmatmul.bf16.gmra.mxu0 %v3850_v17 }
 0x25c   : > { %v1087_v38 = vadd.f32 %v1047_v49, %v3569_v12  ;;  %1665 = vmatmul.bf16.gmra.mxu1 %v3700_v30  ;;  %v820_v12 = vadd.s32 232, %v3599_v16  ;;  %v1737_v30 = vmax.f32 %v1572_v1, 0.0 }
 0x25d   : > { %v1394_v5 = vpop.f32.mrf.mxu2  ;;  %v3859_v33 = vpop.f32.mrf.mxu3 }
 0x25e   : > { %1119 = vst [vmem:[%s3616_s3 + $0xd0] sm:$0xff] %v1087_v38  ;;  %v852_v62 = vcvt.s32.f32 %v820_v12  ;;  %v1151_v55 = vadd.f32 1.0, %v1087_v38  ;;  %v3869_v48 = vmul.f32 %v1737_v30, %v1394_v5 }
 0x260   : > { %v1574_v59 = vpop.f32.mrf.mxu0  ;;  %v885_v43 = vadd.f32 %v3602_v25, %v852_v62 }
 0x261   : > { %v1048_v63 = vpop.f32.mrf.mxu1  ;;  %v1739_v35 = vmax.f32 %v1574_v59, 0.0 }
 0x262   : > { %v1049_v34 = vadd.f32 %v1048_v63, %v919_v24  ;;  %v853_v24 = vcvt.s32.f32 %v821_v61  ;;  %v921_v26 = vmul.f32 %v3608_v27, %v885_v43 }
 0x264   : > { %v1088_v41 = vadd.f32 %v1049_v34, %v3571_v13  ;;  %v886_v63 = vadd.f32 %v3602_v25, %v853_v24 }
 0x265   : > { %v1396_v51 = vpop.f32.mrf.mxu2  ;;  %v3866_v53 = vpop.f32.mrf.mxu3 }
 0x266   : > { %1120 = vst [vmem:[%s3616_s3 + $0xd8] sm:$0xff] %v1088_v41  ;;  %v1152_v32 = vadd.f32 1.0, %v1088_v41  ;;  %v3872_v21 = vmul.f32 %v1739_v35, %v1396_v51  ;;  %v922_v41 = vmul.f32 %v3608_v27, %v886_v63  ;;  %v854_v51 = vcvt.s32.f32 %v822_v29 }
 0x268   : > { %v1857_v56 = vpack.c.bf16 %v3872_v21, %v3869_v48  ;;  %v1577_v1 = vpop.f32.mrf.mxu0  ;;  %v3876_v10 = vpack.c.bf16 %v1152_v32, %v1151_v55 }
 0x269   : > { %v1051_v13 = vpop.f32.mrf.mxu1  ;;  %v1741_v34 = vmax.f32 %v1577_v1, 0.0 }
 0x26a   : > { %v1052_v49 = vadd.f32 %v1051_v13, %v920_v58  ;;  %1438 = vmatmul.bf16.gmra.mxu2 %v3876_v10  ;;  %1527 = vmatmul.bf16.gmra.mxu3 %v3876_v10 }
 0x26b   : > { %1616 = vmatmul.bf16.gmra.mxu0 %v3876_v10 }
 0x26c   : > { %v1089_v38 = vadd.f32 %v1052_v49, %v3579_v44  ;;  %1670 = vmatmul.bf16.gmra.mxu1 %v3715_v3  ;;  %v887_v49 = vadd.f32 %v3602_v25, %v854_v51 }
 0x26d   : > { %v1399_v5 = vpop.f32.mrf.mxu2  ;;  %v3885_v8 = vpop.f32.mrf.mxu3 }
 0x26e   : > { %1121 = vst [vmem:[%s3616_s3 + $0xe0] sm:$0xff] %v1089_v38  ;;  %v1153_v58 = vadd.f32 1.0, %v1089_v38  ;;  %v3895_v62 = vmul.f32 %v1741_v34, %v1399_v5  ;;  %v923_v24 = vmul.f32 %v3608_v27, %v887_v49 }
 0x270   : > { %v1579_v11 = vpop.f32.mrf.mxu0 }
 0x271   : > { %v1053_v59 = vpop.f32.mrf.mxu1  ;;  %v1743_v30 = vmax.f32 %v1579_v11, 0.0 }
 0x272   : > { %v1054_v12 = vadd.f32 %v1053_v59, %v921_v26 }
 0x274   : > { %v1090_v44 = vadd.f32 %v1054_v12, %v3581_v45 }
 0x275   : > { %v1401_v3 = vpop.f32.mrf.mxu2  ;;  %v3892_v35 = vpop.f32.mrf.mxu3 }
 0x276   : > { %1122 = vst [vmem:[%s3616_s3 + $0xe8] sm:$0xff] %v1090_v44  ;;  %v1154_v55 = vadd.f32 1.0, %v1090_v44  ;;  %v3898_v32 = vmul.f32 %v1743_v30, %v1401_v3 }
 0x278   : > { %v1859_v16 = vpack.c.bf16 %v3898_v32, %v3895_v62  ;;  %v1582_v1 = vpop.f32.mrf.mxu0  ;;  %v3902_v13 = vpack.c.bf16 %v1154_v55, %v1153_v58 }
 0x279   : > { %v1056_v45 = vpop.f32.mrf.mxu1  ;;  %v1745_v63 = vmax.f32 %v1582_v1, 0.0 }
 0x27a   : > { %v1057_v61 = vadd.f32 %v1056_v45, %v922_v41  ;;  %1443 = vmatmul.bf16.gmra.mxu2 %v3902_v13  ;;  %1532 = vmatmul.bf16.gmra.mxu3 %v3902_v13 }
 0x27b   : > { %1621 = vmatmul.bf16.gmra.mxu0 %v3902_v13 }
 0x27c   : > { %v1091_v43 = vadd.f32 %v1057_v61, %v3589_v46  ;;  %1675 = vmatmul.bf16.gmra.mxu1 %v3730_v37 }
 0x27d   : > { %v1404_v38 = vpop.f32.mrf.mxu2  ;;  %v3910_v5 = vpop.f32.mrf.mxu3 }
 0x27e   : > { %1123 = vst [vmem:[%s3616_s3 + $0xf0] sm:$0xff] %v1091_v43  ;;  %v1155_v46 = vadd.f32 1.0, %v1091_v43  ;;  %v3917_v30 = vmul.f32 %v1745_v63, %v1404_v38 }
 0x280   : > { %v1584_v26 = vpop.f32.mrf.mxu0 }
 0x281   : > { %v1058_v11 = vpop.f32.mrf.mxu1  ;;  %v1747_v29 = vmax.f32 %v1584_v26, 0.0 }
 0x282   : > { %v1059_v59 = vadd.f32 %v1058_v11, %v923_v24 }
 0x284   : > { %v1092_v25 = vadd.f32 %v1059_v59, %v3591_v47 }
 0x285   : > { %v1406_v12 = vpop.f32.mrf.mxu2  ;;  %v3915_v34 = vpop.f32.mrf.mxu3 }
 0x286   : > { %1124 = vst [vmem:[%s3616_s3 + $0xf8] sm:$0xff] %v1092_v25  ;;  %v1156_v37 = vadd.f32 1.0, %v1092_v25  ;;  %v3920_v44 = vmul.f32 %v1747_v29, %v1406_v12 }
 0x288   : > { %v1861_v27 = vpack.c.bf16 %v3920_v44, %v3917_v30  ;;  %v1587_v3 = vpop.f32.mrf.mxu0  ;;  %v3924_v41 = vpack.c.bf16 %v1156_v37, %v1155_v46 }
 0x289   : > { %v1641_v51 = vpop.f32.mrf.mxu1  ;;  %v1749_v49 = vmax.f32 %v1587_v3, 0.0 }
 0x28a   : > { %1448 = vmatmul.bf16.gmra.mxu2 %v3924_v41  ;;  %1537 = vmatmul.bf16.gmra.mxu3 %v3924_v41  ;;  %v1722_v45 = vmax.f32 %v1641_v51, 0.0 }
 0x28b   : > { %1626 = vmatmul.bf16.gmra.mxu0 %v3924_v41 }
 0x28c   : > { %1680 = vmatmul.bf16.gmra.mxu1 %v3746_v6  ;;  %v1786_v11 = vmul.f32 %v1722_v45, %v3755_v7 }
 0x28d   : > { %v1409_v47 = vpop.f32.mrf.mxu2  ;;  %v3930_v58 = vpop.f32.mrf.mxu3 }
 0x28e   : > { %v3936_v59 = vmul.f32 %v1749_v49, %v1409_v47 }
 0x290   : > { %v1589_v55 = vpop.f32.mrf.mxu0 }
 0x291   : > { %v1643_v1 = vpop.f32.mrf.mxu1  ;;  %v1751_v43 = vmax.f32 %v1589_v55, 0.0 }
 0x292   : > { %v1724_v61 = vmax.f32 %v1643_v1, 0.0 }
 0x294   : > { %v1788_v38 = vmul.f32 %v1724_v61, %v3764_v20 }
 0x295   : > { %v1411_v24 = vpop.f32.mrf.mxu2  ;;  %v3933_v26 = vpop.f32.mrf.mxu3 }
 0x296   : > { %v3938_v63 = vmul.f32 %v1751_v43, %v1411_v24  ;;  %v1850_v6 = vpack.c.bf16 %v1788_v38, %v1786_v11 }
 0x298   : > { %v1863_v29 = vpack.c.bf16 %v3938_v63, %v3936_v59  ;;  %v1592_v25 = vpop.f32.mrf.mxu0 }
 0x299   : > { %v1646_v12 = vpop.f32.mrf.mxu1  ;;  %v1753_v47 = vmax.f32 %v1592_v25, 0.0 }
 0x29a   : > { %2017 = vmatmul.bf16.vlgmr.msrb.gmra.mxu2 %v1849_v23  ;;  %2106 = vmatmul.bf16.vlgmr.msrb.gmra.mxu3 %v1850_v6  ;;  %v1726_v3 = vmax.f32 %v1646_v12, 0.0 }
 0x29c   : > { %1685 = vmatmul.bf16.gmra.mxu1 %v3772_v52  ;;  %v1790_v9 = vmul.f32 %v1726_v3, %v3781_v0 }
 0x29d   : > { %v1414_v20 = vpop.f32.mrf.mxu2  ;;  %v3946_v46 = vpop.f32.mrf.mxu3 }
 0x29e   : > { %v3952_v60 = vmul.f32 %v1753_v47, %v1414_v20 }
 0x2a0   : > { %v1594_v7 = vpop.f32.mrf.mxu0 }
 0x2a1   : > { %v1648_v37 = vpop.f32.mrf.mxu1  ;;  %v1755_v55 = vmax.f32 %v1594_v7, 0.0 }
 0x2a2   : > { %v1728_v51 = vmax.f32 %v1648_v37, 0.0 }
 0x2a4   : > { %v1792_v1 = vmul.f32 %v1728_v51, %v3790_v39 }
 0x2a5   : > { %v1416_v45 = vpop.f32.mrf.mxu2  ;;  %v3949_v61 = vpop.f32.mrf.mxu3 }
 0x2a6   : > { %v3954_v23 = vmul.f32 %v1755_v55, %v1416_v45  ;;  %v1852_v43 = vpack.c.bf16 %v1792_v1, %v1790_v9 }
 0x2a8   : > { %v1865_v52 = vpack.c.bf16 %v3954_v23, %v3952_v60  ;;  %v1597_v49 = vpop.f32.mrf.mxu0 }
 0x2a9   : > { %v1651_v38 = vpop.f32.mrf.mxu1  ;;  %v1757_v12 = vmax.f32 %v1597_v49, 0.0 }
 0x2aa   : > { %2022 = vmatmul.bf16.gmra.mxu2 %v1851_v28  ;;  %2111 = vmatmul.bf16.gmra.mxu3 %v1852_v43  ;;  %v1730_v6 = vmax.f32 %v1651_v38, 0.0 }
 0x2ac   : > { %1690 = vmatmul.bf16.gmra.mxu1 %v3798_v54  ;;  %v1794_v2 = vmul.f32 %v1730_v6, %v3807_v36 }
 0x2ad   : > { %v1419_v39 = vpop.f32.mrf.mxu2  ;;  %v3962_v24 = vpop.f32.mrf.mxu3 }
 0x2ae   : > { %v3968_v18 = vmul.f32 %v1757_v12, %v1419_v39 }
 0x2b0   : > { %v1599_v0 = vpop.f32.mrf.mxu0 }
 0x2b1   : > { %v1653_v11 = vpop.f32.mrf.mxu1  ;;  %v1759_v20 = vmax.f32 %v1599_v0, 0.0 }
 0x2b2   : > { %v1732_v25 = vmax.f32 %v1653_v11, 0.0 }
 0x2b4   : > { %v1796_v7 = vmul.f32 %v1732_v25, %v3816_v42 }
 0x2b5   : > { %v1421_v37 = vpop.f32.mrf.mxu2  ;;  %v3965_v3 = vpop.f32.mrf.mxu3 }
 0x2b6   : > { %v3970_v28 = vmul.f32 %v1759_v20, %v1421_v37  ;;  %v1854_v47 = vpack.c.bf16 %v1796_v7, %v1794_v2 }
 0x2b8   : > { %v1867_v54 = vpack.c.bf16 %v3970_v28, %v3968_v18  ;;  %v1602_v51 = vpop.f32.mrf.mxu0 }
 0x2b9   : > { %v1656_v55 = vpop.f32.mrf.mxu1  ;;  %v1761_v43 = vmax.f32 %v1602_v51, 0.0 }
 0x2ba   : > { %2027 = vmatmul.bf16.gmra.mxu2 %v1853_v14  ;;  %2116 = vmatmul.bf16.gmra.mxu3 %v1854_v47  ;;  %v1734_v9 = vmax.f32 %v1656_v55, 0.0 }
 0x2bc   : > { %1695 = vmatmul.bf16.gmra.mxu1 %v3824_v4  ;;  %v1798_v50 = vmul.f32 %v1734_v9, %v3833_v15 }
 0x2bd   : > { %v1424_v42 = vpop.f32.mrf.mxu2  ;;  %v3978_v1 = vpop.f32.mrf.mxu3 }
 0x2be   : > { %v3984_v22 = vmul.f32 %v1761_v43, %v1424_v42 }
 0x2c0   : > { %v1604_v36 = vpop.f32.mrf.mxu0 }
 0x2c1   : > { %v1658_v45 = vpop.f32.mrf.mxu1  ;;  %v1763_v38 = vmax.f32 %v1604_v36, 0.0 }
 0x2c2   : > { %v1736_v49 = vmax.f32 %v1658_v45, 0.0 }
 0x2c4   : > { %v1800_v39 = vmul.f32 %v1736_v49, %v3842_v31 }
 0x2c5   : > { %v1426_v0 = vpop.f32.mrf.mxu2  ;;  %v3981_v11 = vpop.f32.mrf.mxu3 }
 0x2c6   : > { %v3986_v14 = vmul.f32 %v1763_v38, %v1426_v0  ;;  %v1856_v25 = vpack.c.bf16 %v1800_v39, %v1798_v50 }
 0x2c8   : > { %v1869_v4 = vpack.c.bf16 %v3986_v14, %v3984_v22  ;;  %v1607_v6 = vpop.f32.mrf.mxu0 }
 0x2c9   : > { %v1661_v12 = vpop.f32.mrf.mxu1  ;;  %v1765_v51 = vmax.f32 %v1607_v6, 0.0 }
 0x2ca   : > { %2032 = vmatmul.bf16.gmra.mxu2 %v1855_v57  ;;  %2121 = vmatmul.bf16.gmra.mxu3 %v1856_v25  ;;  %v1738_v37 = vmax.f32 %v1661_v12, 0.0 }
 0x2cc   : > { %1700 = vmatmul.bf16.gmra.mxu1 %v3850_v17  ;;  %v1802_v40 = vmul.f32 %v1738_v37, %v3859_v33 }
 0x2cd   : > { %v1429_v31 = vpop.f32.mrf.mxu2  ;;  %v3994_v20 = vpop.f32.mrf.mxu3 }
 0x2ce   : > { %v4000_v19 = vmul.f32 %v1765_v51, %v1429_v31 }
 0x2d0   : > { %v1609_v15 = vpop.f32.mrf.mxu0 }
 0x2d1   : > { %v1663_v7 = vpop.f32.mrf.mxu1  ;;  %v1767_v47 = vmax.f32 %v1609_v15, 0.0 }
 0x2d2   : > { %v1740_v2 = vmax.f32 %v1663_v7, 0.0 }
 0x2d4   : > { %v1804_v55 = vmul.f32 %v1740_v2, %v3866_v53 }
 0x2d5   : > { %v1431_v42 = vpop.f32.mrf.mxu2  ;;  %v3997_v36 = vpop.f32.mrf.mxu3 }
 0x2d6   : > { %v4002_v57 = vmul.f32 %v1767_v47, %v1431_v42  ;;  %v1858_v9 = vpack.c.bf16 %v1804_v55, %v1802_v40 }
 0x2d8   : > { %v1871_v17 = vpack.c.bf16 %v4002_v57, %v4000_v19  ;;  %v1612_v45 = vpop.f32.mrf.mxu0 }
 0x2d9   : > { %v1666_v49 = vpop.f32.mrf.mxu1  ;;  %v1769_v50 = vmax.f32 %v1612_v45, 0.0 }
 0x2da   : > { %2037 = vmatmul.bf16.gmra.mxu2 %v1857_v56  ;;  %2126 = vmatmul.bf16.gmra.mxu3 %v1858_v9  ;;  %v1742_v39 = vmax.f32 %v1666_v49, 0.0 }
 0x2dc   : > { %1705 = vmatmul.bf16.gmra.mxu1 %v3876_v10  ;;  %v1806_v48 = vmul.f32 %v1742_v39, %v3885_v8 }
 0x2dd   : > { %v1434_v53 = vpop.f32.mrf.mxu2  ;;  %v4010_v43 = vpop.f32.mrf.mxu3 }
 0x2de   : > { %v4016_v21 = vmul.f32 %v1769_v50, %v1434_v53 }
 0x2e0   : > { %v1614_v33 = vpop.f32.mrf.mxu0 }
 0x2e1   : > { %v1668_v38 = vpop.f32.mrf.mxu1  ;;  %v1771_v6 = vmax.f32 %v1614_v33, 0.0 }
 0x2e2   : > { %v1744_v0 = vmax.f32 %v1668_v38, 0.0 }
 0x2e4   : > { %v1808_v25 = vmul.f32 %v1744_v0, %v3892_v35 }
 0x2e5   : > { %v1436_v12 = vpop.f32.mrf.mxu2  ;;  %v4013_v31 = vpop.f32.mrf.mxu3 }
 0x2e6   : > { %v4018_v56 = vmul.f32 %v1771_v6, %v1436_v12  ;;  %v1860_v7 = vpack.c.bf16 %v1808_v25, %v1806_v48 }
 0x2e8   : > { %v1873_v10 = vpack.c.bf16 %v4018_v56, %v4016_v21  ;;  %v1617_v15 = vpop.f32.mrf.mxu0 }
 0x2e9   : > { %v1671_v37 = vpop.f32.mrf.mxu1  ;;  %v1773_v42 = vmax.f32 %v1617_v15, 0.0 }
 0x2ea   : > { %2042 = vmatmul.bf16.gmra.mxu2 %v1859_v16  ;;  %2131 = vmatmul.bf16.gmra.mxu3 %v1860_v7  ;;  %v1746_v47 = vmax.f32 %v1671_v37, 0.0 }
 0x2ec   : > { %1710 = vmatmul.bf16.gmra.mxu1 %v3902_v13  ;;  %v1810_v62 = vmul.f32 %v1746_v47, %v3910_v5 }
 0x2ed   : > { %v1439_v35 = vpop.f32.mrf.mxu2  ;;  %v4026_v2 = vpop.f32.mrf.mxu3 }
 0x2ee   : > { %v4032_v32 = vmul.f32 %v1773_v42, %v1439_v35 }
 0x2f0   : > { %v1619_v8 = vpop.f32.mrf.mxu0 }
 0x2f1   : > { %v1673_v51 = vpop.f32.mrf.mxu1  ;;  %v1775_v40 = vmax.f32 %v1619_v8, 0.0 }
 0x2f2   : > { %v1748_v55 = vmax.f32 %v1673_v51, 0.0 }
 0x2f4   : > { %v1812_v45 = vmul.f32 %v1748_v55, %v3915_v34 }
 0x2f5   : > { %v1441_v9 = vpop.f32.mrf.mxu2  ;;  %v4029_v49 = vpop.f32.mrf.mxu3 }
 0x2f6   : > { %v4034_v16 = vmul.f32 %v1775_v40, %v1441_v9  ;;  %v1862_v33 = vpack.c.bf16 %v1812_v45, %v1810_v62 }
 0x2f8   : > { %v1875_v13 = vpack.c.bf16 %v4034_v16, %v4032_v32  ;;  %v1622_v53 = vpop.f32.mrf.mxu0 }
 0x2f9   : > { %v1676_v38 = vpop.f32.mrf.mxu1  ;;  %v1777_v25 = vmax.f32 %v1622_v53, 0.0 }
 0x2fa   : > { %2047 = vmatmul.bf16.gmra.mxu2 %v1861_v27  ;;  %2136 = vmatmul.bf16.gmra.mxu3 %v1862_v33  ;;  %v1750_v50 = vmax.f32 %v1676_v38, 0.0 }
 0x2fc   : > { %1715 = vmatmul.bf16.gmra.mxu1 %v3924_v41  ;;  %v1814_v30 = vmul.f32 %v1750_v50, %v3930_v58 }
 0x2fd   : > { %v1444_v34 = vpop.f32.mrf.mxu2  ;;  %v4042_v39 = vpop.f32.mrf.mxu3 }
 0x2fe   : > { %v4048_v44 = vmul.f32 %v1777_v25, %v1444_v34 }
 0x300   : > { %v1624_v5 = vpop.f32.mrf.mxu0 }
 0x301   : > { %v1678_v0 = vpop.f32.mrf.mxu1  ;;  %v1779_v12 = vmax.f32 %v1624_v5, 0.0 }
 0x302   : > { %v1752_v6 = vmax.f32 %v1678_v0, 0.0 }
 0x304   : > { %v1816_v48 = vmul.f32 %v1752_v6, %v3933_v26 }
 0x305   : > { %v1446_v15 = vpop.f32.mrf.mxu2  ;;  %v4045_v7 = vpop.f32.mrf.mxu3 }
 0x306   : > { %v4050_v27 = vmul.f32 %v1779_v12, %v1446_v15  ;;  %v1864_v35 = vpack.c.bf16 %v1816_v48, %v1814_v30 }
 0x308   : > { %v1877_v41 = vpack.c.bf16 %v4050_v27, %v4048_v44  ;;  %v1627_v37 = vpop.f32.mrf.mxu0 }
 0x309   : > { %v1681_v8 = vpop.f32.mrf.mxu1  ;;  %v1781_v40 = vmax.f32 %v1627_v37, 0.0 }
 0x30a   : > { %2052 = vmatmul.bf16.gmra.mxu2 %v1863_v29  ;;  %2141 = vmatmul.bf16.gmra.mxu3 %v1864_v35  ;;  %v1754_v55 = vmax.f32 %v1681_v8, 0.0 }
 0x30c   : > { %v1818_v33 = vmul.f32 %v1754_v55, %v3946_v46 }
 0x30d   : > { %v1449_v26 = vpop.f32.mrf.mxu2  ;;  %v4057_v51 = vpop.f32.mrf.mxu3 }
 0x30e   : > { %v4063_v59 = vmul.f32 %v1781_v40, %v1449_v26 }
 0x310   : > { %v1629_v47 = vpop.f32.mrf.mxu0 }
 0x311   : > { %v1683_v58 = vpop.f32.mrf.mxu1  ;;  %v1783_v45 = vmax.f32 %v1629_v47, 0.0 }
 0x312   : > { %v1756_v42 = vmax.f32 %v1683_v58, 0.0 }
 0x314   : > { %v1820_v9 = vmul.f32 %v1756_v42, %v3949_v61 }
 0x315   : > { %v1451_v62 = vpop.f32.mrf.mxu2  ;;  %v4060_v53 = vpop.f32.mrf.mxu3 }
 0x316   : > { %v4065_v63 = vmul.f32 %v1783_v45, %v1451_v62  ;;  %v1866_v38 = vpack.c.bf16 %v1820_v9, %v1818_v33 }
 0x318   : > { %v1879_v29 = vpack.c.bf16 %v4065_v63, %v4063_v59 }
 0x319   : > { %v1686_v34 = vpop.f32.mrf.mxu1 }
 0x31a   : > { %2057 = vmatmul.bf16.gmra.mxu2 %v1865_v52  ;;  %2146 = vmatmul.bf16.gmra.mxu3 %v1866_v38  ;;  %v1758_v50 = vmax.f32 %v1686_v34, 0.0 }
 0x31c   : > { %v1822_v60 = vmul.f32 %v1758_v50, %v3962_v24 }
 0x31d   : > { %v2018_v61 = vpop.f32.mrf.mxu2  ;;  %v2107_v5 = vpop.f32.mrf.mxu3 }
 0x31e   : > { %v2108_v0 = vadd.f32 %v2107_v5, %v2018_v61 }
 0x320   : > { %2187 = vst [vmem:[%s4073_s4] sm:$0xff] %v2108_v0 }
 0x321   : > { %v1688_v46 = vpop.f32.mrf.mxu1 }
 0x322   : > { %v1760_v6 = vmax.f32 %v1688_v46, 0.0 }
 0x324   : > { %v1824_v25 = vmul.f32 %v1760_v6, %v3965_v3 }
 0x325   : > { %v2020_v12 = vpop.f32.mrf.mxu2  ;;  %v2109_v48 = vpop.f32.mrf.mxu3 }
 0x326   : > { %v2110_v23 = vadd.f32 %v2109_v48, %v2020_v12  ;;  %v1868_v52 = vpack.c.bf16 %v1824_v25, %v1822_v60 }
 0x328   : > { %2188 = vst [vmem:[%s4073_s4 + $0x8] sm:$0xff] %v2110_v23 }
 0x329   : > { %v1691_v15 = vpop.f32.mrf.mxu1 }
 0x32a   : > { %2062 = vmatmul.bf16.gmra.mxu2 %v1867_v54  ;;  %2151 = vmatmul.bf16.gmra.mxu3 %v1868_v52  ;;  %v1762_v3 = vmax.f32 %v1691_v15, 0.0 }
 0x32c   : > { %v1826_v55 = vmul.f32 %v1762_v3, %v3978_v1 }
 0x32d   : > { %v2023_v30 = vpop.f32.mrf.mxu2  ;;  %v2112_v37 = vpop.f32.mrf.mxu3 }
 0x32e   : > { %v2113_v35 = vadd.f32 %v2112_v37, %v2023_v30 }
 0x330   : > { %2189 = vst [vmem:[%s4073_s4 + $0x10] sm:$0xff] %v2113_v35 }
 0x331   : > { %v1693_v8 = vpop.f32.mrf.mxu1 }
 0x332   : > { %v1764_v26 = vmax.f32 %v1693_v8, 0.0 }
 0x334   : > { %v1828_v24 = vmul.f32 %v1764_v26, %v3981_v11 }
 0x335   : > { %v2025_v47 = vpop.f32.mrf.mxu2  ;;  %v2114_v58 = vpop.f32.mrf.mxu3 }
 0x336   : > { %v2115_v42 = vadd.f32 %v2114_v58, %v2025_v47  ;;  %v1870_v40 = vpack.c.bf16 %v1828_v24, %v1826_v55 }
 0x338   : > { %2190 = vst [vmem:[%s4073_s4 + $0x18] sm:$0xff] %v2115_v42 }
 0x339   : > { %v1696_v18 = vpop.f32.mrf.mxu1 }
 0x33a   : > { %2067 = vmatmul.bf16.gmra.mxu2 %v1869_v4  ;;  %2156 = vmatmul.bf16.gmra.mxu3 %v1870_v40  ;;  %v1766_v11 = vmax.f32 %v1696_v18, 0.0 }
 0x33c   : > { %v1830_v34 = vmul.f32 %v1766_v11, %v3994_v20 }
 0x33d   : > { %v2028_v28 = vpop.f32.mrf.mxu2  ;;  %v2117_v54 = vpop.f32.mrf.mxu3 }
 0x33e   : > { %v2118_v45 = vadd.f32 %v2117_v54, %v2028_v28 }
 0x340   : > { %2191 = vst [vmem:[%s4073_s4 + $0x20] sm:$0xff] %v2118_v45 }
 0x341   : > { %v1698_v9 = vpop.f32.mrf.mxu1 }
 0x342   : > { %v1768_v62 = vmax.f32 %v1698_v9, 0.0 }
 0x344   : > { %v1832_v1 = vmul.f32 %v1768_v62, %v3997_v36 }
 0x345   : > { %v2030_v33 = vpop.f32.mrf.mxu2  ;;  %v2119_v38 = vpop.f32.mrf.mxu3 }
 0x346   : > { %v2120_v61 = vadd.f32 %v2119_v38, %v2030_v33  ;;  %v1872_v5 = vpack.c.bf16 %v1832_v1, %v1830_v34 }
 0x348   : > { %2192 = vst [vmem:[%s4073_s4 + $0x28] sm:$0xff] %v2120_v61 }
 0x349   : > { %v1701_v22 = vpop.f32.mrf.mxu1 }
 0x34a   : > { %2072 = vmatmul.bf16.gmra.mxu2 %v1871_v17  ;;  %2161 = vmatmul.bf16.gmra.mxu3 %v1872_v5  ;;  %v1770_v36 = vmax.f32 %v1701_v22, 0.0 }
 0x34c   : > { %v1834_v12 = vmul.f32 %v1770_v36, %v4010_v43 }
 0x34d   : > { %v2033_v14 = vpop.f32.mrf.mxu2  ;;  %v2122_v4 = vpop.f32.mrf.mxu3 }
 0x34e   : > { %v2123_v0 = vadd.f32 %v2122_v4, %v2033_v14 }
 0x350   : > { %2193 = vst [vmem:[%s4073_s4 + $0x30] sm:$0xff] %v2123_v0 }
 0x351   : > { %v1703_v46 = vpop.f32.mrf.mxu1 }
 0x352   : > { %v1772_v50 = vmax.f32 %v1703_v46, 0.0 }
 0x354   : > { %v1836_v20 = vmul.f32 %v1772_v50, %v4013_v31 }
 0x355   : > { %v2035_v6 = vpop.f32.mrf.mxu2  ;;  %v2124_v25 = vpop.f32.mrf.mxu3 }
 0x356   : > { %v2125_v48 = vadd.f32 %v2124_v25, %v2035_v6  ;;  %v1874_v60 = vpack.c.bf16 %v1836_v20, %v1834_v12 }
 0x358   : > { %2194 = vst [vmem:[%s4073_s4 + $0x38] sm:$0xff] %v2125_v48 }
 0x359   : > { %v1706_v19 = vpop.f32.mrf.mxu1 }
 0x35a   : > { %2077 = vmatmul.bf16.gmra.mxu2 %v1873_v10  ;;  %2166 = vmatmul.bf16.gmra.mxu3 %v1874_v60  ;;  %v1774_v31 = vmax.f32 %v1706_v19, 0.0 }
 0x35c   : > { %v1838_v35 = vmul.f32 %v1774_v31, %v4026_v2 }
 0x35d   : > { %v2038_v57 = vpop.f32.mrf.mxu2  ;;  %v2127_v17 = vpop.f32.mrf.mxu3 }
 0x35e   : > { %v2128_v23 = vadd.f32 %v2127_v17, %v2038_v57 }
 0x360   : > { %2195 = vst [vmem:[%s4073_s4 + $0x40] sm:$0xff] %v2128_v23 }
 0x361   : > { %v1708_v52 = vpop.f32.mrf.mxu1 }
 0x362   : > { %v1776_v15 = vmax.f32 %v1708_v52, 0.0 }
 0x364   : > { %v1840_v43 = vmul.f32 %v1776_v15, %v4029_v49 }
 0x365   : > { %v2040_v30 = vpop.f32.mrf.mxu2  ;;  %v2129_v37 = vpop.f32.mrf.mxu3 }
 0x366   : > { %v2130_v8 = vadd.f32 %v2129_v37, %v2040_v30  ;;  %v1876_v3 = vpack.c.bf16 %v1840_v43, %v1838_v35 }
 0x368   : > { %2196 = vst [vmem:[%s4073_s4 + $0x48] sm:$0xff] %v2130_v8 }
 0x369   : > { %v1711_v21 = vpop.f32.mrf.mxu1 }
 0x36a   : > { %2082 = vmatmul.bf16.gmra.mxu2 %v1875_v13  ;;  %2171 = vmatmul.bf16.gmra.mxu3 %v1876_v3  ;;  %v1778_v49 = vmax.f32 %v1711_v21, 0.0 }
 0x36c   : > { %v1842_v42 = vmul.f32 %v1778_v49, %v4042_v39 }
 0x36d   : > { %v2043_v56 = vpop.f32.mrf.mxu2  ;;  %v2132_v10 = vpop.f32.mrf.mxu3 }
 0x36e   : > { %v2133_v26 = vadd.f32 %v2132_v10, %v2043_v56 }
 0x370   : > { %2197 = vst [vmem:[%s4073_s4 + $0x50] sm:$0xff] %v2133_v26 }
 0x371   : > { %v1713_v24 = vpop.f32.mrf.mxu1 }
 0x372   : > { %v1780_v47 = vmax.f32 %v1713_v24, 0.0 }
 0x374   : > { %v1844_v2 = vmul.f32 %v1780_v47, %v4045_v7 }
 0x375   : > { %v2045_v58 = vpop.f32.mrf.mxu2  ;;  %v2134_v55 = vpop.f32.mrf.mxu3 }
 0x376   : > { %v2135_v40 = vadd.f32 %v2134_v55, %v2045_v58  ;;  %v1878_v18 = vpack.c.bf16 %v1844_v2, %v1842_v42 }
 0x378   : > { %2198 = vst [vmem:[%s4073_s4 + $0x58] sm:$0xff] %v2135_v40 }
 0x379   : > { %v1716_v32 = vpop.f32.mrf.mxu1 }
 0x37a   : > { %2087 = vmatmul.bf16.gmra.mxu2 %v1877_v41  ;;  %2176 = vmatmul.bf16.gmra.mxu3 %v1878_v18  ;;  %v1782_v54 = vmax.f32 %v1716_v32, 0.0 }
 0x37c   : > { %v1846_v62 = vmul.f32 %v1782_v54, %v4057_v51 }
 0x37d   : > { %v2048_v16 = vpop.f32.mrf.mxu2  ;;  %v2137_v13 = vpop.f32.mrf.mxu3 }
 0x37e   : > { %v2138_v28 = vadd.f32 %v2137_v13, %v2048_v16 }
 0x380   : > { %2199 = vst [vmem:[%s4073_s4 + $0x60] sm:$0xff] %v2138_v28 }
 0x381   : > { %v1718_v7 = vpop.f32.mrf.mxu1 }
 0x382   : > { %v1784_v45 = vmax.f32 %v1718_v7, 0.0 }
 0x384   : > { %v1848_v39 = vmul.f32 %v1784_v45, %v4060_v53 }
 0x385   : > { %v2050_v9 = vpop.f32.mrf.mxu2  ;;  %v2139_v11 = vpop.f32.mrf.mxu3 }
 0x386   : > { %v2140_v44 = vadd.f32 %v2139_v11, %v2050_v9  ;;  %v1880_v27 = vpack.c.bf16 %v1848_v39, %v1846_v62 }
 0x388   : > { %2200 = vst [vmem:[%s4073_s4 + $0x68] sm:$0xff] %v2140_v44 }
 0x38a   : > { %2092 = vmatmul.bf16.gmra.mxu2 %v1879_v29  ;;  %2181 = vmatmul.bf16.gmra.mxu3 %v1880_v27 }
 0x38d   : > { %v2053_v41 = vpop.f32.mrf.mxu2  ;;  %v2142_v1 = vpop.f32.mrf.mxu3 }
 0x38e   : > { %v2143_v33 = vadd.f32 %v2142_v1, %v2053_v41 }
 0x390   : > { %2201 = vst [vmem:[%s4073_s4 + $0x70] sm:$0xff] %v2143_v33 }
 0x395   : > { %v2055_v51 = vpop.f32.mrf.mxu2  ;;  %v2144_v53 = vpop.f32.mrf.mxu3 }
 0x396   : > { %v2145_v38 = vadd.f32 %v2144_v53, %v2055_v51 }
 0x398   : > { %2202 = vst [vmem:[%s4073_s4 + $0x78] sm:$0xff] %v2145_v38 }
 0x39d   : > { %v2058_v59 = vpop.f32.mrf.mxu2  ;;  %v2147_v63 = vpop.f32.mrf.mxu3 }
 0x39e   : > { %3105 = shalt.err (!%p3102_p9)
}
 0x39f   : > { %s3207_s25 = smov 128   ;;  %s3208_s16 = smov 8   ;;  %v2148_v29 = vadd.f32 %v2147_v63, %v2058_v59 }
 0x3a0   : > { %2800 = dma.vmem_to_hbm [thread:$0]  (%p3346_p3), %s2255_s24, 4096, %s2257_s12, %s2225_s7, %s3207_s25, %s3207_s25, %s3208_s16  }
 0x3a1   : > { %2203 = vst [vmem:[%s4073_s4 + $0x80] sm:$0xff] %v2148_v29  ;;  %s2236_s3 = scalar_lea.hbm %s4206_s8, %s3596_s18  ;;  %s2237_s17 = sshll.u32 %s4073_s4, 4  ;;  %s2238_s17 = int_to_ptr.vmem [resolvable:$true] %s2237_s17 }
 0x3a2   : > { %s2239_s11 = sshll.u32 %s2236_s3, 4  ;;  %s2220_s29 = scalar_lea.sflag [#allocation6], %s3402_s27  ;;  %s2240_s11 = int_to_ptr.hbm [resolvable:$true] %s2239_s11 }
 0x3a3   : > { %s3120_s12 = sshra.s32 %s2240_s11, 4  ;;  %s3126_s18 = scalar_lea.hbm %s4206_s8, 512  ;;  %s3121_s12 = int_to_ptr.hbm [resolvable:$true] %s3120_s12 }
 0x3a4   : > { %s3122_s24 = scalar_lea.hbm %s3121_s12, 256  ;;  %p3127_p5 = scmp.lt.s32.totalorder %s3121_s12, %s4206_s8 }
 0x3a5   : > { %v2060_v34 = vpop.f32.mrf.mxu2  ;;  %v2149_v61 = vpop.f32.mrf.mxu3  ;;  %p3123_p12 = scmp.ne.s32.totalorder %s3121_s12, %s3122_s24  ;;  %p3128_p7 = scmp.lt.s32.totalorder %s3126_s18, %s3122_s24 }
 0x3a6   : > { %v2150_v5 = vadd.f32 %v2149_v61, %v2060_v34 }
 0x3a7   : > { %p3124_p13 = pnand %p3123_p12, %p3346_p3  ;;  %p3129_p1 = por %p3128_p7, %p3127_p5 }
 0x3a8   : > { %2204 = vst [vmem:[%s4073_s4 + $0x88] sm:$0xff] %v2150_v5 }
 0x3a9   : > { %p3125_p0 = pneg %p3124_p13 }
 0x3ab   : > { %p3130_p4 = pnand %p3129_p1, %p3125_p0 }
 0x3ad   : > { %v2063_v22 = vpop.f32.mrf.mxu2  ;;  %v2152_v14 = vpop.f32.mrf.mxu3 }
 0x3ae   : > { %v2153_v4 = vadd.f32 %v2152_v14, %v2063_v22 }
 0x3b0   : > { %2205 = vst [vmem:[%s4073_s4 + $0x90] sm:$0xff] %v2153_v4 }
 0x3b5   : > { %v2065_v0 = vpop.f32.mrf.mxu2  ;;  %v2154_v46 = vpop.f32.mrf.mxu3 }
 0x3b6   : > { %v2155_v36 = vadd.f32 %v2154_v46, %v2065_v0 }
 0x3b8   : > { %2206 = vst [vmem:[%s4073_s4 + $0x98] sm:$0xff] %v2155_v36 }
 0x3bd   : > { %v2068_v50 = vpop.f32.mrf.mxu2  ;;  %v2157_v20 = vpop.f32.mrf.mxu3 }
 0x3be   : > { %v2158_v6 = vadd.f32 %v2157_v20, %v2068_v50 }
 0x3c0   : > { %2207 = vst [vmem:[%s4073_s4 + $0xa0] sm:$0xff] %v2158_v6 }
 0x3c5   : > { %v2070_v25 = vpop.f32.mrf.mxu2  ;;  %v2159_v12 = vpop.f32.mrf.mxu3 }
 0x3c6   : > { %v2160_v48 = vadd.f32 %v2159_v12, %v2070_v25 }
 0x3c8   : > { %2208 = vst [vmem:[%s4073_s4 + $0xa8] sm:$0xff] %v2160_v48 }
 0x3cd   : > { %v2073_v60 = vpop.f32.mrf.mxu2  ;;  %v2162_v19 = vpop.f32.mrf.mxu3 }
 0x3ce   : > { %v2163_v57 = vadd.f32 %v2162_v19, %v2073_v60 }
 0x3d0   : > { %2209 = vst [vmem:[%s4073_s4 + $0xb0] sm:$0xff] %v2163_v57 }
 0x3d5   : > { %v2075_v17 = vpop.f32.mrf.mxu2  ;;  %v2164_v23 = vpop.f32.mrf.mxu3 }
 0x3d6   : > { %v2165_v52 = vadd.f32 %v2164_v23, %v2075_v17 }
 0x3d8   : > { %2210 = vst [vmem:[%s4073_s4 + $0xb8] sm:$0xff] %v2165_v52 }
 0x3dd   : > { %v2078_v31 = vpop.f32.mrf.mxu2  ;;  %v2167_v15 = vpop.f32.mrf.mxu3 }
 0x3de   : > { %v2168_v43 = vadd.f32 %v2167_v15, %v2078_v31 }
 0x3e0   : > { %2211 = vst [vmem:[%s4073_s4 + $0xc0] sm:$0xff] %v2168_v43 }
 0x3e5   : > { %v2080_v30 = vpop.f32.mrf.mxu2  ;;  %v2169_v37 = vpop.f32.mrf.mxu3 }
 0x3e6   : > { %v2170_v35 = vadd.f32 %v2169_v37, %v2080_v30 }
 0x3e8   : > { %2212 = vst [vmem:[%s4073_s4 + $0xc8] sm:$0xff] %v2170_v35 }
 0x3ed   : > { %v2083_v8 = vpop.f32.mrf.mxu2  ;;  %v2172_v3 = vpop.f32.mrf.mxu3 }
 0x3ee   : > { %v2173_v21 = vadd.f32 %v2172_v3, %v2083_v8 }
 0x3f0   : > { %2213 = vst [vmem:[%s4073_s4 + $0xd0] sm:$0xff] %v2173_v21 }
 0x3f5   : > { %v2085_v56 = vpop.f32.mrf.mxu2  ;;  %v2174_v10 = vpop.f32.mrf.mxu3 }
 0x3f6   : > { %v2175_v26 = vadd.f32 %v2174_v10, %v2085_v56 }
 0x3f8   : > { %2214 = vst [vmem:[%s4073_s4 + $0xd8] sm:$0xff] %v2175_v26 }
 0x3fd   : > { %v2088_v24 = vpop.f32.mrf.mxu2  ;;  %v2177_v49 = vpop.f32.mrf.mxu3 }
 0x3fe   : > { %v2178_v47 = vadd.f32 %v2177_v49, %v2088_v24 }
 0x400   : > { %2215 = vst [vmem:[%s4073_s4 + $0xe0] sm:$0xff] %v2178_v47 }
 0x405   : > { %v2090_v2 = vpop.f32.mrf.mxu2  ;;  %v2179_v58 = vpop.f32.mrf.mxu3 }
 0x406   : > { %v2180_v55 = vadd.f32 %v2179_v58, %v2090_v2 }
 0x408   : > { %2216 = vst [vmem:[%s4073_s4 + $0xe8] sm:$0xff] %v2180_v55 }
 0x40d   : > { %v2093_v42 = vpop.f32.mrf.mxu2  ;;  %v2182_v40 = vpop.f32.mrf.mxu3 }
 0x40e   : > { %v2183_v18 = vadd.f32 %v2182_v40, %v2093_v42 }
 0x410   : > { %2217 = vst [vmem:[%s4073_s4 + $0xf0] sm:$0xff] %v2183_v18 }
 0x415   : > { %v2095_v32 = vpop.f32.mrf.mxu2  ;;  %v2184_v16 = vpop.f32.mrf.mxu3 }
 0x416   : > { %v2185_v13 = vadd.f32 %v2184_v16, %v2095_v32 }
 0x418   : > { %2218 = vst [vmem:[%s4073_s4 + $0xf8] sm:$0xff] %v2185_v13 }
 0x419   : > { %3133 = shalt.err (!%p3130_p4)
}
 0x41a   : > { %2799 = dma.vmem_to_hbm [thread:$0]  (%p3346_p3), %s2238_s17, 4096, %s2240_s11, %s2220_s29, %s3207_s25, %s3207_s25, %s3208_s16  }
 0x41b PF: > { %s2271_s27 = sand.u32 1, %s3182_s13   ;;  %p4229_p8 = scmp.ge.s32.totalorder %s3194_s15, 2 }
 0x41c   : > { %s2272_s4 = scalar_lea.sflag [#allocation6], %s2271_s27 }
 0x41d   : > { %p2824_p2 = pnand %p4229_p8, %p3297_p6 }
 0x41f   : > { %p2825_p10 = pneg %p2824_p2 }
 0x421   : > { %3173 = dma.done.wait (%p2825_p10), %s2272_s4, 4096  }
 0x422   : > { %3175 = vsyncadd (%p2825_p10), %s2272_s4, 4294963200  ;;  %s2282_s0 = scalar_lea.sflag [#allocation17], %s2271_s27 }
 0x423   : > { %3177 = dma.done.wait (%p2825_p10), %s2282_s0, 4096  }
 0x424   : > { %3179 = vsyncadd (%p2825_p10), %s2282_s0, 4294963200  ;;  %s4230_s21 = sld [smem:[#allocation26_spill]]  ;;  %p39_p3 = scmp.ge.s32.totalorder %s3336_s20, 4  }
 0x425   : > { %s4231_s0 = sld [smem:[#allocation27_spill]]  ;;  %s4232_s13 = smov %s3186_s14 }
 0x426   : > { %s4234_s15 = smov %s3336_s20  ;;  %41 = sbr.rel (!%p39_p3) target bundleno = 21 (0x15), region = 139 }
 0x42a   : > { %s4233_s14 = smov %s4230_s21 }
 0x42b   :  { %2288 = vsyncpa [#allocation5], 1 }
 0x42c   :  { %2290 = vsyncpa [#allocation5 + $0x1], 1 }
 0x42d   :  { %2291 = vsyncpa [#allocation8], 1 }
 0x42e   :  { %2293 = vsyncpa [#allocation8 + $0x1], 1 }
 0x42f   :  { %2294 = vsyncpa [#allocation11], 1 }
 0x430   :  { %2295 = vsyncpa [#allocation14], 1 }
 0x431   :  { %2296 = vsyncpa [#allocation6], 1 }
 0x432   :  { %2298 = vsyncpa [#allocation6 + $0x1], 1 }
 0x433   :  { %2299 = vsyncpa [#allocation17], 1 }
 0x434   :  { %2301 = vsyncpa [#allocation17 + $0x1], 1 }

</bundles_post_ra>
